<compile_context>
chip_gen: v7x
topology: tpu7x:2x2x1
jax: 0.10.0
libtpu: 0.0.40
codegen_flags: <defaults>
</compile_context>

<pallas_src>
import functools

import jax
import jax.numpy as jnp
from jax.experimental import pallas as pl
from jax.experimental.pallas import tpu as pltpu


def _make_divisible(v, divisor=8, min_value=None):
    if min_value is None:
        min_value = divisor
    new_v = max(min_value, int(v + divisor / 2) // divisor * divisor)
    if new_v < 0.9 * v:
        new_v += divisor
    return new_v


# ---------------------------------------------------------------------------
# Numerically stable activation helpers (EUP-bound; free vs. the HBM stream).
# ---------------------------------------------------------------------------
def _softplus(x):
    return jnp.maximum(x, 0.0) + jnp.log1p(jnp.exp(-jnp.abs(x)))


def _mish(x):
    return x * jnp.tanh(_softplus(x))


def _sigmoid(x):
    e = jnp.exp(-jnp.abs(x))
    r = 1.0 / (1.0 + e)
    return jnp.where(x >= 0, r, 1.0 - r)


# ---------------------------------------------------------------------------
# Fused FFMM kernel: one grid step == TB batch elements.
# Every activation block is (TB, channels, lanes) with lanes in {HWp, 1}:
# channels sit on sublanes, spatial (HWp) is lane-dense, pooling is a lane
# reduce, gates broadcast along lanes, and every matmul is a batched
# dot_general 'boc,bcl->bol' with no transposes or reshapes.
# ---------------------------------------------------------------------------
def _ffmm_kernel(x1_ref, x2_ref,
                 s1w1_ref, s1b1_ref, s1w2_ref, s1b2_ref,
                 c1w_ref, c1b_ref, c2w_ref, c2b_ref, c3w_ref, c3b_ref,
                 s2w1_ref, s2b1_ref, s2w2_ref, s2b2_ref,
                 c4w_ref, c4b_ref,
                 o_ref, *, hw_valid):
    f32 = jnp.float32
    x1 = x1_ref[...].astype(f32)                 # (TB, C1, HWp)
    x2 = x2_ref[...].astype(f32)                 # (TB, C2, HWp)
    TB, C1, HWp = x1.shape
    O = o_ref.shape[1]
    inv_hw = 1.0 / hw_valid

    def bmm(w2d, x3d):
        """(Co, Ci) x (TB, Ci, L) -> (TB, Co, L); batched matmul, no transposes."""
        wb = jnp.broadcast_to(w2d, (TB,) + w2d.shape)
        return jnp.einsum("boc,bcl->bol", wb, x3d, preferred_element_type=f32)

    # Load the tiny weights once; static slices along the channel-concat
    # boundaries are free and replace the old 28-argument pre-split plumbing.
    s1w1 = s1w1_ref[...].astype(f32)             # (hid1, C1+C2)
    s1w2 = s1w2_ref[...].astype(f32)             # (C1+C2, hid1)
    s1b2 = s1b2_ref[...].astype(f32)             # (C1+C2, 1)
    c3w = c3w_ref[...].astype(f32)               # (O, C1+C2)
    s2w1 = s2w1_ref[...].astype(f32)             # (hid2, 3O)
    s2w2 = s2w2_ref[...].astype(f32)             # (3O, hid2)
    s2b2 = s2b2_ref[...].astype(f32)             # (3O, 1)
    c4w = c4w_ref[...].astype(f32)               # (O, 3O)

    # ---- SE gate #1: squeeze(concat(x1, x2)) -> tiny MLP -> per-channel gates
    # Padded HW lanes of x1/x2 are zero (wrapper pads), so plain sums are exact.
    p1 = jnp.sum(x1, axis=-1, keepdims=True) * inv_hw            # (TB, C1, 1)
    p2 = jnp.sum(x2, axis=-1, keepdims=True) * inv_hw            # (TB, C2, 1)
    h = bmm(s1w1[:, :C1], p1) + bmm(s1w1[:, C1:], p2) \
        + s1b1_ref[...].astype(f32)[None]                         # (TB, hid1, 1)
    m = _mish(h)
    g1a = _sigmoid(bmm(s1w2[:C1, :], m) + s1b2[None, :C1, :])     # (TB, C1, 1)
    g1b = _sigmoid(bmm(s1w2[C1:, :], m) + s1b2[None, C1:, :])     # (TB, C2, 1)

    # ---- conv3 on the gated concat, conv1/conv2 on the raw inputs ----
    xc = bmm(c3w[:, :C1], x1 * g1a) + bmm(c3w[:, C1:], x2 * g1b) \
         + c3b_ref[...].astype(f32)[None]                          # (TB, O, HWp)
    y1 = (bmm(c1w_ref[...].astype(f32), x1)
          + c1b_ref[...].astype(f32)[None]) * xc                   # (TB, O, HWp)
    y2 = (bmm(c2w_ref[...].astype(f32), x2)
          + c2b_ref[...].astype(f32)[None]) * xc                   # (TB, O, HWp)

    # ---- SE gate #2 over concat(y1, y2, xc) channels ----
    if HWp != hw_valid:
        # Padded lanes of y1/y2/xc hold bias-derived junk; mask them out of the pool.
        col = jax.lax.broadcasted_iota(jnp.int32, (1, 1, HWp), 2)
        lane_mask = (col < hw_valid).astype(f32)
        q1 = jnp.sum(y1 * lane_mask, axis=-1, keepdims=True) * inv_hw
        q2 = jnp.sum(y2 * lane_mask, axis=-1, keepdims=True) * inv_hw
        q3 = jnp.sum(xc * lane_mask, axis=-1, keepdims=True) * inv_hw
    else:
        q1 = jnp.sum(y1, axis=-1, keepdims=True) * inv_hw
        q2 = jnp.sum(y2, axis=-1, keepdims=True) * inv_hw
        q3 = jnp.sum(xc, axis=-1, keepdims=True) * inv_hw

    h2 = (bmm(s2w1[:, :O], q1) + bmm(s2w1[:, O:2 * O], q2)
          + bmm(s2w1[:, 2 * O:], q3) + s2b1_ref[...].astype(f32)[None])
    m2 = _mish(h2)
    g2a = _sigmoid(bmm(s2w2[:O, :], m2) + s2b2[None, :O, :])       # (TB, O, 1)
    g2b = _sigmoid(bmm(s2w2[O:2 * O, :], m2) + s2b2[None, O:2 * O, :])
    g2c = _sigmoid(bmm(s2w2[2 * O:, :], m2) + s2b2[None, 2 * O:, :])

    # ---- conv4 on the gated concat; lane-dense store (HWp % 128 == 0) ----
    out = (bmm(c4w[:, :O], y1 * g2a) + bmm(c4w[:, O:2 * O], y2 * g2b)
           + bmm(c4w[:, 2 * O:], xc * g2c) + c4b_ref[...].astype(f32)[None])
    o_ref[...] = out.astype(o_ref.dtype)


def _rep_spec(arr):
    nd = arr.ndim
    return pl.BlockSpec(arr.shape, lambda b, _nd=nd: (0,) * _nd)


def _round_up(x, m):
    return -(-x // m) * m


def ffmm(x1, x2, params, *, batch_tile=None):
    """x1: (B, indim1, H, W), x2: (B, indim2, H, W) -> (B, outdim, H, W).

    Works for f32 or bf16 inputs (compute/accumulation stays f32)."""
    B, C1, H, W = x1.shape
    Bx, C2, H2, W2 = x2.shape
    assert B == Bx and (H, W) == (H2, W2)
    HW = H * W
    HWp = _round_up(HW, 128)                       # lane-dense (unmasked) stores
    p = params
    O = p["conv4_w"].shape[0]
    dtype = x1.dtype
    itemsize = jnp.dtype(dtype).itemsize

    # ---- generation-aware VMEM budget & batch tile --------------------------
    try:
        vmem_cap = int(pltpu.get_tpu_info().vmem_capacity_bytes)
    except Exception:                              # conservative fallback (v7x)
        vmem_cap = 64 * 1024 * 1024
    # Scoped VMEM limit: ~half of physical (32 MiB on v7x, 64 MiB on v5e/v6e).
    vmem_limit = max(16 * 1024 * 1024, min(vmem_cap // 2, 96 * 1024 * 1024))

    if batch_tile is None:
        sub_io = 8 * max(1, 4 // itemsize)         # sublane granule (elements)
        stream = 2 * (_round_up(C1, sub_io) + _round_up(C2, sub_io)
                      + _round_up(O, sub_io)) * HWp * itemsize   # double-buffered blocks
        live = (_round_up(C1, 8) + _round_up(C2, 8)
                + 4 * _round_up(O, 8)) * HWp * 4                  # f32 x1,x2,xc,y1,y2,out
        budget = int(vmem_limit * 0.75) - (1 << 20)               # headroom for weights
        TB = max(1, budget // max(1, stream + live))
        TB = min(TB, 256, B)
        if B >= 2:
            TB = min(TB, _round_up(B, 2) // 2)     # >=2 grid steps for v7x's 2 TCs
    else:
        TB = max(1, min(int(batch_tile), B))
    Bp = _round_up(B, TB)

    x1r = x1.reshape(B, C1, HW)
    x2r = x2.reshape(B, C2, HW)
    if Bp != B or HWp != HW:
        x1r = jnp.pad(x1r, ((0, Bp - B), (0, 0), (0, HWp - HW)))
        x2r = jnp.pad(x2r, ((0, Bp - B), (0, 0), (0, HWp - HW)))

    weight_args = (
        p["se1_w1"], p["se1_b1"], p["se1_w2"], p["se1_b2"],
        p["conv1_w"], p["conv1_b"], p["conv2_w"], p["conv2_b"],
        p["conv3_w"], p["conv3_b"],
        p["se2_w1"], p["se2_b1"], p["se2_w2"], p["se2_b2"],
        p["conv4_w"], p["conv4_b"],
    )

    in_specs = [
        pl.BlockSpec((TB, C1, HWp), lambda b: (b, 0, 0)),
        pl.BlockSpec((TB, C2, HWp), lambda b: (b, 0, 0)),
    ] + [_rep_spec(w) for w in weight_args]

    out = pl.pallas_call(
        functools.partial(_ffmm_kernel, hw_valid=HW),
        out_shape=jax.ShapeDtypeStruct((Bp, O, HWp), dtype),
        grid=(Bp // TB,),
        in_specs=in_specs,
        out_specs=pl.BlockSpec((TB, O, HWp), lambda b: (b, 0, 0)),
        compiler_params=pltpu.CompilerParams(
            dimension_semantics=("parallel",),      # megacore sharding on v7x
            vmem_limit_bytes=vmem_limit,
        ),
    )(x1r, x2r, *weight_args)

    return out[:B, :, :HW].reshape(B, O, H, W)


# ---------------------------------------------------------------------------
# Parameter init (shapes match the PyTorch module; 1x1 convs stored as 2-D).
# ---------------------------------------------------------------------------
def init_ffmm_params(key, indim1, indim2, outdim, reduction=4):
    C = indim1 + indim2
    hid1 = _make_divisible(C // reduction)
    C3 = outdim * 3
    hid2 = _make_divisible(C3 // reduction)
    ks = jax.random.split(key, 16)

    def w(k, shape):
        return 0.1 * jax.random.normal(k, shape, jnp.float32)

    return dict(
        se1_w1=w(ks[0], (hid1, C)),   se1_b1=w(ks[1], (hid1, 1)),
        se1_w2=w(ks[2], (C, hid1)),   se1_b2=w(ks[3], (C, 1)),
        conv1_w=w(ks[4], (outdim, indim1)), conv1_b=w(ks[5], (outdim, 1)),
        conv2_w=w(ks[6], (outdim, indim2)), conv2_b=w(ks[7], (outdim, 1)),
        conv3_w=w(ks[8], (outdim, C)),      conv3_b=w(ks[9], (outdim, 1)),
        se2_w1=w(ks[10], (hid2, C3)), se2_b1=w(ks[11], (hid2, 1)),
        se2_w2=w(ks[12], (C3, hid2)), se2_b2=w(ks[13], (C3, 1)),
        conv4_w=w(ks[14], (outdim, C3)), conv4_b=w(ks[15], (outdim, 1)),
    )


# ---------------------------------------------------------------------------
# Pure-JAX reference (mirrors the PyTorch forward).
# ---------------------------------------------------------------------------
def _se_ref(x, w1, b1, w2, b2):
    hp = jax.lax.Precision.HIGHEST
    pooled = jnp.mean(x, axis=(2, 3))                                    # (B, C)
    h = jnp.einsum("bc,hc->bh", pooled, w1, precision=hp) + b1[:, 0]
    h = h * jnp.tanh(jax.nn.softplus(h))
    g = jax.nn.sigmoid(jnp.einsum("bh,ch->bc", h, w2, precision=hp) + b2[:, 0])
    return x * g[:, :, None, None]


def _conv1x1_ref(x, w, b):
    hp = jax.lax.Precision.HIGHEST
    return jnp.einsum("bchw,oc->bohw", x, w, precision=hp) + b.reshape(1, -1, 1, 1)


def ffmm_ref(x1, x2, p):
    x = jnp.concatenate([x1, x2], axis=1)
    x = _se_ref(x, p["se1_w1"], p["se1_b1"], p["se1_w2"], p["se1_b2"])
    y1 = _conv1x1_ref(x1, p["conv1_w"], p["conv1_b"])
    y2 = _conv1x1_ref(x2, p["conv2_w"], p["conv2_b"])
    xc = _conv1x1_ref(x, p["conv3_w"], p["conv3_b"])
    y1 = y1 * xc
    y2 = y2 * xc
    out = jnp.concatenate([y1, y2, xc], axis=1)
    out = _se_ref(out, p["se2_w1"], p["se2_b1"], p["se2_w2"], p["se2_b2"])
    return _conv1x1_ref(out, p["conv4_w"], p["conv4_b"])


if __name__ == "__main__":
    indim1, indim2, outdim = 4, 4, 4
    B, H, W = 2, 16, 16

    key = jax.random.PRNGKey(0)
    k1, k2, kp = jax.random.split(key, 3)
    x1 = jax.random.normal(k1, (B, indim1, H, W), jnp.float32)
    x2 = jax.random.normal(k2, (B, indim2, H, W), jnp.float32)
    params = init_ffmm_params(kp, indim1, indim2, outdim)

    out = ffmm(x1, x2, params)
    out = jax.block_until_ready(out)

    ref = ffmm_ref(x1, x2, params)
    assert out.shape == (B, outdim, H, W), out.shape
    assert jnp.allclose(out, ref, atol=1e-4, rtol=1e-4), "mismatch vs reference"

    print("KERNEL_OK")
</pallas_src>

<mosaic_0001>
module attributes {stable_mosaic.version = 11 : i64} {
  func.func @_ffmm_kernel(%arg0: i32, %arg1: memref<1x4x256xf32, #tpu.memory_space<vmem>>, %arg2: memref<1x4x256xf32, #tpu.memory_space<vmem>>, %arg3: memref<8x8xf32, #tpu.memory_space<vmem>>, %arg4: memref<8x1xf32, #tpu.memory_space<vmem>>, %arg5: memref<8x8xf32, #tpu.memory_space<vmem>>, %arg6: memref<8x1xf32, #tpu.memory_space<vmem>>, %arg7: memref<4x4xf32, #tpu.memory_space<vmem>>, %arg8: memref<4x1xf32, #tpu.memory_space<vmem>>, %arg9: memref<4x4xf32, #tpu.memory_space<vmem>>, %arg10: memref<4x1xf32, #tpu.memory_space<vmem>>, %arg11: memref<4x8xf32, #tpu.memory_space<vmem>>, %arg12: memref<4x1xf32, #tpu.memory_space<vmem>>, %arg13: memref<8x12xf32, #tpu.memory_space<vmem>>, %arg14: memref<8x1xf32, #tpu.memory_space<vmem>>, %arg15: memref<12x8xf32, #tpu.memory_space<vmem>>, %arg16: memref<12x1xf32, #tpu.memory_space<vmem>>, %arg17: memref<4x12xf32, #tpu.memory_space<vmem>>, %arg18: memref<4x1xf32, #tpu.memory_space<vmem>>, %arg19: memref<1x4x256xf32, #tpu.memory_space<vmem>>) attributes {dimension_semantics = [#tpu.dimension_semantics<parallel>], iteration_bounds = array<i64: 2>, scalar_prefetch = 0 : i64, scratch_operands = 0 : i64, tpu.core_type = #tpu.core_type<tc>, window_params = [{transform_indices = @transform_0, window_bounds = array<i64: 1, 4, 256>}, {transform_indices = @transform_1, window_bounds = array<i64: 1, 4, 256>}, {pipeline_mode = #tpu.pipeline_mode<synchronous>, transform_indices = @transform_2, window_bounds = array<i64: 8, 8>}, {pipeline_mode = #tpu.pipeline_mode<synchronous>, transform_indices = @transform_3, window_bounds = array<i64: 8, 1>}, {pipeline_mode = #tpu.pipeline_mode<synchronous>, transform_indices = @transform_4, window_bounds = array<i64: 8, 8>}, {pipeline_mode = #tpu.pipeline_mode<synchronous>, transform_indices = @transform_5, window_bounds = array<i64: 8, 1>}, {pipeline_mode = #tpu.pipeline_mode<synchronous>, transform_indices = @transform_6, window_bounds = array<i64: 4, 4>}, {pipeline_mode = #tpu.pipeline_mode<synchronous>, transform_indices = @transform_7, window_bounds = array<i64: 4, 1>}, {pipeline_mode = #tpu.pipeline_mode<synchronous>, transform_indices = @transform_8, window_bounds = array<i64: 4, 4>}, {pipeline_mode = #tpu.pipeline_mode<synchronous>, transform_indices = @transform_9, window_bounds = array<i64: 4, 1>}, {pipeline_mode = #tpu.pipeline_mode<synchronous>, transform_indices = @transform_10, window_bounds = array<i64: 4, 8>}, {pipeline_mode = #tpu.pipeline_mode<synchronous>, transform_indices = @transform_11, window_bounds = array<i64: 4, 1>}, {pipeline_mode = #tpu.pipeline_mode<synchronous>, transform_indices = @transform_12, window_bounds = array<i64: 8, 12>}, {pipeline_mode = #tpu.pipeline_mode<synchronous>, transform_indices = @transform_13, window_bounds = array<i64: 8, 1>}, {pipeline_mode = #tpu.pipeline_mode<synchronous>, transform_indices = @transform_14, window_bounds = array<i64: 12, 8>}, {pipeline_mode = #tpu.pipeline_mode<synchronous>, transform_indices = @transform_15, window_bounds = array<i64: 12, 1>}, {pipeline_mode = #tpu.pipeline_mode<synchronous>, transform_indices = @transform_16, window_bounds = array<i64: 4, 12>}, {pipeline_mode = #tpu.pipeline_mode<synchronous>, transform_indices = @transform_17, window_bounds = array<i64: 4, 1>}, {transform_indices = @transform_18, window_bounds = array<i64: 1, 4, 256>}]} {
    %c0 = arith.constant 0 : index
    %c0_0 = arith.constant 0 : index
    %c0_1 = arith.constant 0 : index
    %0 = vector.load %arg1[%c0, %c0_0, %c0_1] : memref<1x4x256xf32, #tpu.memory_space<vmem>>, vector<1x4x256xf32>
    %c0_2 = arith.constant 0 : index
    %c0_3 = arith.constant 0 : index
    %c0_4 = arith.constant 0 : index
    %1 = vector.load %arg2[%c0_2, %c0_3, %c0_4] : memref<1x4x256xf32, #tpu.memory_space<vmem>>, vector<1x4x256xf32>
    %c0_5 = arith.constant 0 : index
    %c0_6 = arith.constant 0 : index
    %2 = vector.load %arg3[%c0_5, %c0_6] : memref<8x8xf32, #tpu.memory_space<vmem>>, vector<8x8xf32>
    %c0_7 = arith.constant 0 : index
    %c0_8 = arith.constant 0 : index
    %3 = vector.load %arg5[%c0_7, %c0_8] : memref<8x8xf32, #tpu.memory_space<vmem>>, vector<8x8xf32>
    %c0_9 = arith.constant 0 : index
    %c0_10 = arith.constant 0 : index
    %4 = vector.load %arg6[%c0_9, %c0_10] : memref<8x1xf32, #tpu.memory_space<vmem>>, vector<8x1xf32>
    %c0_11 = arith.constant 0 : index
    %c0_12 = arith.constant 0 : index
    %5 = vector.load %arg11[%c0_11, %c0_12] : memref<4x8xf32, #tpu.memory_space<vmem>>, vector<4x8xf32>
    %c0_13 = arith.constant 0 : index
    %c0_14 = arith.constant 0 : index
    %6 = vector.load %arg13[%c0_13, %c0_14] : memref<8x12xf32, #tpu.memory_space<vmem>>, vector<8x12xf32>
    %c0_15 = arith.constant 0 : index
    %c0_16 = arith.constant 0 : index
    %7 = vector.load %arg15[%c0_15, %c0_16] : memref<12x8xf32, #tpu.memory_space<vmem>>, vector<12x8xf32>
    %c0_17 = arith.constant 0 : index
    %c0_18 = arith.constant 0 : index
    %8 = vector.load %arg16[%c0_17, %c0_18] : memref<12x1xf32, #tpu.memory_space<vmem>>, vector<12x1xf32>
    %c0_19 = arith.constant 0 : index
    %c0_20 = arith.constant 0 : index
    %9 = vector.load %arg17[%c0_19, %c0_20] : memref<4x12xf32, #tpu.memory_space<vmem>>, vector<4x12xf32>
    %cst = arith.constant dense<0.000000e+00> : vector<1x4xf32>
    %10 = vector.multi_reduction <add>, %0, %cst [2] : vector<1x4x256xf32> to vector<1x4xf32>
    %11 = vector.shape_cast %10 : vector<1x4xf32> to vector<1x4x1xf32>
    %cst_21 = arith.constant 3.906250e-03 : f32
    %12 = vector.broadcast %cst_21 : f32 to vector<1x4x1xf32>
    %13 = arith.mulf %11, %12 : vector<1x4x1xf32>
    %cst_22 = arith.constant dense<0.000000e+00> : vector<1x4xf32>
    %14 = vector.multi_reduction <add>, %1, %cst_22 [2] : vector<1x4x256xf32> to vector<1x4xf32>
    %15 = vector.shape_cast %14 : vector<1x4xf32> to vector<1x4x1xf32>
    %cst_23 = arith.constant 3.906250e-03 : f32
    %16 = vector.broadcast %cst_23 : f32 to vector<1x4x1xf32>
    %17 = arith.mulf %15, %16 : vector<1x4x1xf32>
    %18 = vector.extract_strided_slice %2 {offsets = [0, 0], sizes = [8, 4], strides = [1, 1]} : vector<8x8xf32> to vector<8x4xf32>
    %19 = vector.shape_cast %18 : vector<8x4xf32> to vector<1x8x4xf32>
    "tpu.trace_start"() <{level = 10 : i32, message = "boc,bcl->bol"}> : () -> ()
    %cst_24 = arith.constant dense<0.000000e+00> : vector<1x8x1xf32>
    %20 = tpu.matmul %19, %13, %cst_24 {dimension_numbers = #tpu.dot_dimension_numbers<[2], [1], [1], [2], [0, 0, 0, 1, 1, 2], [0], [0]>} : vector<1x8x4xf32>, vector<1x4x1xf32>, vector<1x8x1xf32> -> vector<1x8x1xf32>
    "tpu.trace_stop"() : () -> ()
    %21 = vector.extract_strided_slice %2 {offsets = [0, 4], sizes = [8, 4], strides = [1, 1]} : vector<8x8xf32> to vector<8x4xf32>
    %22 = vector.shape_cast %21 : vector<8x4xf32> to vector<1x8x4xf32>
    "tpu.trace_start"() <{level = 10 : i32, message = "boc,bcl->bol"}> : () -> ()
    %cst_25 = arith.constant dense<0.000000e+00> : vector<1x8x1xf32>
    %23 = tpu.matmul %22, %17, %cst_25 {dimension_numbers = #tpu.dot_dimension_numbers<[2], [1], [1], [2], [0, 0, 0, 1, 1, 2], [0], [0]>} : vector<1x8x4xf32>, vector<1x4x1xf32>, vector<1x8x1xf32> -> vector<1x8x1xf32>
    "tpu.trace_stop"() : () -> ()
    %24 = arith.addf %20, %23 : vector<1x8x1xf32>
    %c0_26 = arith.constant 0 : index
    %c0_27 = arith.constant 0 : index
    %25 = vector.load %arg4[%c0_26, %c0_27] : memref<8x1xf32, #tpu.memory_space<vmem>>, vector<8x1xf32>
    %26 = vector.shape_cast %25 : vector<8x1xf32> to vector<1x8x1xf32>
    %27 = arith.addf %24, %26 : vector<1x8x1xf32>
    %cst_28 = arith.constant 0.000000e+00 : f32
    %28 = vector.broadcast %cst_28 : f32 to vector<1x8x1xf32>
    %29 = arith.maximumf %27, %28 : vector<1x8x1xf32>
    %30 = math.absf %27 : vector<1x8x1xf32>
    %cst_29 = arith.constant 0.000000e+00 : f32
    %31 = vector.broadcast %cst_29 : f32 to vector<1x8x1xf32>
    %32 = arith.subf %31, %30 : vector<1x8x1xf32>
    %33 = math.exp %32 : vector<1x8x1xf32>
    %34 = math.log1p %33 : vector<1x8x1xf32>
    %35 = arith.addf %29, %34 : vector<1x8x1xf32>
    %36 = math.tanh %35 : vector<1x8x1xf32>
    %37 = arith.mulf %27, %36 : vector<1x8x1xf32>
    %38 = vector.extract_strided_slice %3 {offsets = [0, 0], sizes = [4, 8], strides = [1, 1]} : vector<8x8xf32> to vector<4x8xf32>
    %39 = vector.shape_cast %38 : vector<4x8xf32> to vector<1x4x8xf32>
    "tpu.trace_start"() <{level = 10 : i32, message = "boc,bcl->bol"}> : () -> ()
    %cst_30 = arith.constant dense<0.000000e+00> : vector<1x4x1xf32>
    %40 = tpu.matmul %39, %37, %cst_30 {dimension_numbers = #tpu.dot_dimension_numbers<[2], [1], [1], [2], [0, 0, 0, 1, 1, 2], [0], [0]>} : vector<1x4x8xf32>, vector<1x8x1xf32>, vector<1x4x1xf32> -> vector<1x4x1xf32>
    "tpu.trace_stop"() : () -> ()
    %41 = vector.extract_strided_slice %4 {offsets = [0, 0], sizes = [4, 1], strides = [1, 1]} : vector<8x1xf32> to vector<4x1xf32>
    %42 = vector.shape_cast %41 : vector<4x1xf32> to vector<1x4x1xf32>
    %43 = arith.addf %40, %42 : vector<1x4x1xf32>
    %44 = math.absf %43 : vector<1x4x1xf32>
    %cst_31 = arith.constant 0.000000e+00 : f32
    %45 = vector.broadcast %cst_31 : f32 to vector<1x4x1xf32>
    %46 = arith.subf %45, %44 : vector<1x4x1xf32>
    %47 = math.exp %46 : vector<1x4x1xf32>
    %cst_32 = arith.constant 1.000000e+00 : f32
    %48 = vector.broadcast %cst_32 : f32 to vector<1x4x1xf32>
    %49 = arith.addf %48, %47 : vector<1x4x1xf32>
    %cst_33 = arith.constant 1.000000e+00 : f32
    %50 = vector.broadcast %cst_33 : f32 to vector<1x4x1xf32>
    %51 = arith.divf %50, %49 : vector<1x4x1xf32>
    %cst_34 = arith.constant 0.000000e+00 : f32
    %52 = vector.broadcast %cst_34 : f32 to vector<1x4x1xf32>
    %53 = arith.cmpf oge, %43, %52 : vector<1x4x1xf32>
    %cst_35 = arith.constant 1.000000e+00 : f32
    %54 = vector.broadcast %cst_35 : f32 to vector<1x4x1xf32>
    %55 = arith.subf %54, %51 : vector<1x4x1xf32>
    %56 = arith.select %53, %51, %55 : vector<1x4x1xi1>, vector<1x4x1xf32>
    %57 = vector.extract_strided_slice %3 {offsets = [4, 0], sizes = [4, 8], strides = [1, 1]} : vector<8x8xf32> to vector<4x8xf32>
    %58 = vector.shape_cast %57 : vector<4x8xf32> to vector<1x4x8xf32>
    "tpu.trace_start"() <{level = 10 : i32, message = "boc,bcl->bol"}> : () -> ()
    %cst_36 = arith.constant dense<0.000000e+00> : vector<1x4x1xf32>
    %59 = tpu.matmul %58, %37, %cst_36 {dimension_numbers = #tpu.dot_dimension_numbers<[2], [1], [1], [2], [0, 0, 0, 1, 1, 2], [0], [0]>} : vector<1x4x8xf32>, vector<1x8x1xf32>, vector<1x4x1xf32> -> vector<1x4x1xf32>
    "tpu.trace_stop"() : () -> ()
    %60 = vector.extract_strided_slice %4 {offsets = [4, 0], sizes = [4, 1], strides = [1, 1]} : vector<8x1xf32> to vector<4x1xf32>
    %61 = vector.shape_cast %60 : vector<4x1xf32> to vector<1x4x1xf32>
    %62 = arith.addf %59, %61 : vector<1x4x1xf32>
    %63 = math.absf %62 : vector<1x4x1xf32>
    %cst_37 = arith.constant 0.000000e+00 : f32
    %64 = vector.broadcast %cst_37 : f32 to vector<1x4x1xf32>
    %65 = arith.subf %64, %63 : vector<1x4x1xf32>
    %66 = math.exp %65 : vector<1x4x1xf32>
    %cst_38 = arith.constant 1.000000e+00 : f32
    %67 = vector.broadcast %cst_38 : f32 to vector<1x4x1xf32>
    %68 = arith.addf %67, %66 : vector<1x4x1xf32>
    %cst_39 = arith.constant 1.000000e+00 : f32
    %69 = vector.broadcast %cst_39 : f32 to vector<1x4x1xf32>
    %70 = arith.divf %69, %68 : vector<1x4x1xf32>
    %cst_40 = arith.constant 0.000000e+00 : f32
    %71 = vector.broadcast %cst_40 : f32 to vector<1x4x1xf32>
    %72 = arith.cmpf oge, %62, %71 : vector<1x4x1xf32>
    %cst_41 = arith.constant 1.000000e+00 : f32
    %73 = vector.broadcast %cst_41 : f32 to vector<1x4x1xf32>
    %74 = arith.subf %73, %70 : vector<1x4x1xf32>
    %75 = arith.select %72, %70, %74 : vector<1x4x1xi1>, vector<1x4x1xf32>
    %76 = vector.extract_strided_slice %5 {offsets = [0, 0], sizes = [4, 4], strides = [1, 1]} : vector<4x8xf32> to vector<4x4xf32>
    %77 = vector.broadcast %56 : vector<1x4x1xf32> to vector<1x4x256xf32>
    %78 = arith.mulf %0, %77 : vector<1x4x256xf32>
    %79 = vector.shape_cast %76 : vector<4x4xf32> to vector<1x4x4xf32>
    "tpu.trace_start"() <{level = 10 : i32, message = "boc,bcl->bol"}> : () -> ()
    %cst_42 = arith.constant dense<0.000000e+00> : vector<1x4x256xf32>
    %80 = tpu.matmul %79, %78, %cst_42 {dimension_numbers = #tpu.dot_dimension_numbers<[2], [1], [1], [2], [0, 0, 0, 1, 1, 2], [0], [0]>} : vector<1x4x4xf32>, vector<1x4x256xf32>, vector<1x4x256xf32> -> vector<1x4x256xf32>
    "tpu.trace_stop"() : () -> ()
    %81 = vector.extract_strided_slice %5 {offsets = [0, 4], sizes = [4, 4], strides = [1, 1]} : vector<4x8xf32> to vector<4x4xf32>
    %82 = vector.broadcast %75 : vector<1x4x1xf32> to vector<1x4x256xf32>
    %83 = arith.mulf %1, %82 : vector<1x4x256xf32>
    %84 = vector.shape_cast %81 : vector<4x4xf32> to vector<1x4x4xf32>
    "tpu.trace_start"() <{level = 10 : i32, message = "boc,bcl->bol"}> : () -> ()
    %cst_43 = arith.constant dense<0.000000e+00> : vector<1x4x256xf32>
    %85 = tpu.matmul %84, %83, %cst_43 {dimension_numbers = #tpu.dot_dimension_numbers<[2], [1], [1], [2], [0, 0, 0, 1, 1, 2], [0], [0]>} : vector<1x4x4xf32>, vector<1x4x256xf32>, vector<1x4x256xf32> -> vector<1x4x256xf32>
    "tpu.trace_stop"() : () -> ()
    %86 = arith.addf %80, %85 : vector<1x4x256xf32>
    %c0_44 = arith.constant 0 : index
    %c0_45 = arith.constant 0 : index
    %87 = vector.load %arg12[%c0_44, %c0_45] : memref<4x1xf32, #tpu.memory_space<vmem>>, vector<4x1xf32>
    %88 = vector.shape_cast %87 : vector<4x1xf32> to vector<1x4x1xf32>
    %89 = vector.broadcast %88 : vector<1x4x1xf32> to vector<1x4x256xf32>
    %90 = arith.addf %86, %89 : vector<1x4x256xf32>
    %c0_46 = arith.constant 0 : index
    %c0_47 = arith.constant 0 : index
    %91 = vector.load %arg7[%c0_46, %c0_47] : memref<4x4xf32, #tpu.memory_space<vmem>>, vector<4x4xf32>
    %92 = vector.shape_cast %91 : vector<4x4xf32> to vector<1x4x4xf32>
    "tpu.trace_start"() <{level = 10 : i32, message = "boc,bcl->bol"}> : () -> ()
    %cst_48 = arith.constant dense<0.000000e+00> : vector<1x4x256xf32>
    %93 = tpu.matmul %92, %0, %cst_48 {dimension_numbers = #tpu.dot_dimension_numbers<[2], [1], [1], [2], [0, 0, 0, 1, 1, 2], [0], [0]>} : vector<1x4x4xf32>, vector<1x4x256xf32>, vector<1x4x256xf32> -> vector<1x4x256xf32>
    "tpu.trace_stop"() : () -> ()
    %c0_49 = arith.constant 0 : index
    %c0_50 = arith.constant 0 : index
    %94 = vector.load %arg8[%c0_49, %c0_50] : memref<4x1xf32, #tpu.memory_space<vmem>>, vector<4x1xf32>
    %95 = vector.shape_cast %94 : vector<4x1xf32> to vector<1x4x1xf32>
    %96 = vector.broadcast %95 : vector<1x4x1xf32> to vector<1x4x256xf32>
    %97 = arith.addf %93, %96 : vector<1x4x256xf32>
    %98 = arith.mulf %97, %90 : vector<1x4x256xf32>
    %c0_51 = arith.constant 0 : index
    %c0_52 = arith.constant 0 : index
    %99 = vector.load %arg9[%c0_51, %c0_52] : memref<4x4xf32, #tpu.memory_space<vmem>>, vector<4x4xf32>
    %100 = vector.shape_cast %99 : vector<4x4xf32> to vector<1x4x4xf32>
    "tpu.trace_start"() <{level = 10 : i32, message = "boc,bcl->bol"}> : () -> ()
    %cst_53 = arith.constant dense<0.000000e+00> : vector<1x4x256xf32>
    %101 = tpu.matmul %100, %1, %cst_53 {dimension_numbers = #tpu.dot_dimension_numbers<[2], [1], [1], [2], [0, 0, 0, 1, 1, 2], [0], [0]>} : vector<1x4x4xf32>, vector<1x4x256xf32>, vector<1x4x256xf32> -> vector<1x4x256xf32>
    "tpu.trace_stop"() : () -> ()
    %c0_54 = arith.constant 0 : index
    %c0_55 = arith.constant 0 : index
    %102 = vector.load %arg10[%c0_54, %c0_55] : memref<4x1xf32, #tpu.memory_space<vmem>>, vector<4x1xf32>
    %103 = vector.shape_cast %102 : vector<4x1xf32> to vector<1x4x1xf32>
    %104 = vector.broadcast %103 : vector<1x4x1xf32> to vector<1x4x256xf32>
    %105 = arith.addf %101, %104 : vector<1x4x256xf32>
    %106 = arith.mulf %105, %90 : vector<1x4x256xf32>
    %cst_56 = arith.constant dense<0.000000e+00> : vector<1x4xf32>
    %107 = vector.multi_reduction <add>, %98, %cst_56 [2] : vector<1x4x256xf32> to vector<1x4xf32>
    %108 = vector.shape_cast %107 : vector<1x4xf32> to vector<1x4x1xf32>
    %cst_57 = arith.constant 3.906250e-03 : f32
    %109 = vector.broadcast %cst_57 : f32 to vector<1x4x1xf32>
    %110 = arith.mulf %108, %109 : vector<1x4x1xf32>
    %cst_58 = arith.constant dense<0.000000e+00> : vector<1x4xf32>
    %111 = vector.multi_reduction <add>, %106, %cst_58 [2] : vector<1x4x256xf32> to vector<1x4xf32>
    %112 = vector.shape_cast %111 : vector<1x4xf32> to vector<1x4x1xf32>
    %cst_59 = arith.constant 3.906250e-03 : f32
    %113 = vector.broadcast %cst_59 : f32 to vector<1x4x1xf32>
    %114 = arith.mulf %112, %113 : vector<1x4x1xf32>
    %cst_60 = arith.constant dense<0.000000e+00> : vector<1x4xf32>
    %115 = vector.multi_reduction <add>, %90, %cst_60 [2] : vector<1x4x256xf32> to vector<1x4xf32>
    %116 = vector.shape_cast %115 : vector<1x4xf32> to vector<1x4x1xf32>
    %cst_61 = arith.constant 3.906250e-03 : f32
    %117 = vector.broadcast %cst_61 : f32 to vector<1x4x1xf32>
    %118 = arith.mulf %116, %117 : vector<1x4x1xf32>
    %119 = vector.extract_strided_slice %6 {offsets = [0, 0], sizes = [8, 4], strides = [1, 1]} : vector<8x12xf32> to vector<8x4xf32>
    %120 = vector.shape_cast %119 : vector<8x4xf32> to vector<1x8x4xf32>
    "tpu.trace_start"() <{level = 10 : i32, message = "boc,bcl->bol"}> : () -> ()
    %cst_62 = arith.constant dense<0.000000e+00> : vector<1x8x1xf32>
    %121 = tpu.matmul %120, %110, %cst_62 {dimension_numbers = #tpu.dot_dimension_numbers<[2], [1], [1], [2], [0, 0, 0, 1, 1, 2], [0], [0]>} : vector<1x8x4xf32>, vector<1x4x1xf32>, vector<1x8x1xf32> -> vector<1x8x1xf32>
    "tpu.trace_stop"() : () -> ()
    %122 = vector.extract_strided_slice %6 {offsets = [0, 4], sizes = [8, 4], strides = [1, 1]} : vector<8x12xf32> to vector<8x4xf32>
    %123 = vector.shape_cast %122 : vector<8x4xf32> to vector<1x8x4xf32>
    "tpu.trace_start"() <{level = 10 : i32, message = "boc,bcl->bol"}> : () -> ()
    %cst_63 = arith.constant dense<0.000000e+00> : vector<1x8x1xf32>
    %124 = tpu.matmul %123, %114, %cst_63 {dimension_numbers = #tpu.dot_dimension_numbers<[2], [1], [1], [2], [0, 0, 0, 1, 1, 2], [0], [0]>} : vector<1x8x4xf32>, vector<1x4x1xf32>, vector<1x8x1xf32> -> vector<1x8x1xf32>
    "tpu.trace_stop"() : () -> ()
    %125 = arith.addf %121, %124 : vector<1x8x1xf32>
    %126 = vector.extract_strided_slice %6 {offsets = [0, 8], sizes = [8, 4], strides = [1, 1]} : vector<8x12xf32> to vector<8x4xf32>
    %127 = vector.shape_cast %126 : vector<8x4xf32> to vector<1x8x4xf32>
    "tpu.trace_start"() <{level = 10 : i32, message = "boc,bcl->bol"}> : () -> ()
    %cst_64 = arith.constant dense<0.000000e+00> : vector<1x8x1xf32>
    %128 = tpu.matmul %127, %118, %cst_64 {dimension_numbers = #tpu.dot_dimension_numbers<[2], [1], [1], [2], [0, 0, 0, 1, 1, 2], [0], [0]>} : vector<1x8x4xf32>, vector<1x4x1xf32>, vector<1x8x1xf32> -> vector<1x8x1xf32>
    "tpu.trace_stop"() : () -> ()
    %129 = arith.addf %125, %128 : vector<1x8x1xf32>
    %c0_65 = arith.constant 0 : index
    %c0_66 = arith.constant 0 : index
    %130 = vector.load %arg14[%c0_65, %c0_66] : memref<8x1xf32, #tpu.memory_space<vmem>>, vector<8x1xf32>
    %131 = vector.shape_cast %130 : vector<8x1xf32> to vector<1x8x1xf32>
    %132 = arith.addf %129, %131 : vector<1x8x1xf32>
    %cst_67 = arith.constant 0.000000e+00 : f32
    %133 = vector.broadcast %cst_67 : f32 to vector<1x8x1xf32>
    %134 = arith.maximumf %132, %133 : vector<1x8x1xf32>
    %135 = math.absf %132 : vector<1x8x1xf32>
    %cst_68 = arith.constant 0.000000e+00 : f32
    %136 = vector.broadcast %cst_68 : f32 to vector<1x8x1xf32>
    %137 = arith.subf %136, %135 : vector<1x8x1xf32>
    %138 = math.exp %137 : vector<1x8x1xf32>
    %139 = math.log1p %138 : vector<1x8x1xf32>
    %140 = arith.addf %134, %139 : vector<1x8x1xf32>
    %141 = math.tanh %140 : vector<1x8x1xf32>
    %142 = arith.mulf %132, %141 : vector<1x8x1xf32>
    %143 = vector.extract_strided_slice %7 {offsets = [0, 0], sizes = [4, 8], strides = [1, 1]} : vector<12x8xf32> to vector<4x8xf32>
    %144 = vector.shape_cast %143 : vector<4x8xf32> to vector<1x4x8xf32>
    "tpu.trace_start"() <{level = 10 : i32, message = "boc,bcl->bol"}> : () -> ()
    %cst_69 = arith.constant dense<0.000000e+00> : vector<1x4x1xf32>
    %145 = tpu.matmul %144, %142, %cst_69 {dimension_numbers = #tpu.dot_dimension_numbers<[2], [1], [1], [2], [0, 0, 0, 1, 1, 2], [0], [0]>} : vector<1x4x8xf32>, vector<1x8x1xf32>, vector<1x4x1xf32> -> vector<1x4x1xf32>
    "tpu.trace_stop"() : () -> ()
    %146 = vector.extract_strided_slice %8 {offsets = [0, 0], sizes = [4, 1], strides = [1, 1]} : vector<12x1xf32> to vector<4x1xf32>
    %147 = vector.shape_cast %146 : vector<4x1xf32> to vector<1x4x1xf32>
    %148 = arith.addf %145, %147 : vector<1x4x1xf32>
    %149 = math.absf %148 : vector<1x4x1xf32>
    %cst_70 = arith.constant 0.000000e+00 : f32
    %150 = vector.broadcast %cst_70 : f32 to vector<1x4x1xf32>
    %151 = arith.subf %150, %149 : vector<1x4x1xf32>
    %152 = math.exp %151 : vector<1x4x1xf32>
    %cst_71 = arith.constant 1.000000e+00 : f32
    %153 = vector.broadcast %cst_71 : f32 to vector<1x4x1xf32>
    %154 = arith.addf %153, %152 : vector<1x4x1xf32>
    %cst_72 = arith.constant 1.000000e+00 : f32
    %155 = vector.broadcast %cst_72 : f32 to vector<1x4x1xf32>
    %156 = arith.divf %155, %154 : vector<1x4x1xf32>
    %cst_73 = arith.constant 0.000000e+00 : f32
    %157 = vector.broadcast %cst_73 : f32 to vector<1x4x1xf32>
    %158 = arith.cmpf oge, %148, %157 : vector<1x4x1xf32>
    %cst_74 = arith.constant 1.000000e+00 : f32
    %159 = vector.broadcast %cst_74 : f32 to vector<1x4x1xf32>
    %160 = arith.subf %159, %156 : vector<1x4x1xf32>
    %161 = arith.select %158, %156, %160 : vector<1x4x1xi1>, vector<1x4x1xf32>
    %162 = vector.extract_strided_slice %7 {offsets = [4, 0], sizes = [4, 8], strides = [1, 1]} : vector<12x8xf32> to vector<4x8xf32>
    %163 = vector.shape_cast %162 : vector<4x8xf32> to vector<1x4x8xf32>
    "tpu.trace_start"() <{level = 10 : i32, message = "boc,bcl->bol"}> : () -> ()
    %cst_75 = arith.constant dense<0.000000e+00> : vector<1x4x1xf32>
    %164 = tpu.matmul %163, %142, %cst_75 {dimension_numbers = #tpu.dot_dimension_numbers<[2], [1], [1], [2], [0, 0, 0, 1, 1, 2], [0], [0]>} : vector<1x4x8xf32>, vector<1x8x1xf32>, vector<1x4x1xf32> -> vector<1x4x1xf32>
    "tpu.trace_stop"() : () -> ()
    %165 = vector.extract_strided_slice %8 {offsets = [4, 0], sizes = [4, 1], strides = [1, 1]} : vector<12x1xf32> to vector<4x1xf32>
    %166 = vector.shape_cast %165 : vector<4x1xf32> to vector<1x4x1xf32>
    %167 = arith.addf %164, %166 : vector<1x4x1xf32>
    %168 = math.absf %167 : vector<1x4x1xf32>
    %cst_76 = arith.constant 0.000000e+00 : f32
    %169 = vector.broadcast %cst_76 : f32 to vector<1x4x1xf32>
    %170 = arith.subf %169, %168 : vector<1x4x1xf32>
    %171 = math.exp %170 : vector<1x4x1xf32>
    %cst_77 = arith.constant 1.000000e+00 : f32
    %172 = vector.broadcast %cst_77 : f32 to vector<1x4x1xf32>
    %173 = arith.addf %172, %171 : vector<1x4x1xf32>
    %cst_78 = arith.constant 1.000000e+00 : f32
    %174 = vector.broadcast %cst_78 : f32 to vector<1x4x1xf32>
    %175 = arith.divf %174, %173 : vector<1x4x1xf32>
    %cst_79 = arith.constant 0.000000e+00 : f32
    %176 = vector.broadcast %cst_79 : f32 to vector<1x4x1xf32>
    %177 = arith.cmpf oge, %167, %176 : vector<1x4x1xf32>
    %cst_80 = arith.constant 1.000000e+00 : f32
    %178 = vector.broadcast %cst_80 : f32 to vector<1x4x1xf32>
    %179 = arith.subf %178, %175 : vector<1x4x1xf32>
    %180 = arith.select %177, %175, %179 : vector<1x4x1xi1>, vector<1x4x1xf32>
    %181 = vector.extract_strided_slice %7 {offsets = [8, 0], sizes = [4, 8], strides = [1, 1]} : vector<12x8xf32> to vector<4x8xf32>
    %182 = vector.shape_cast %181 : vector<4x8xf32> to vector<1x4x8xf32>
    "tpu.trace_start"() <{level = 10 : i32, message = "boc,bcl->bol"}> : () -> ()
    %cst_81 = arith.constant dense<0.000000e+00> : vector<1x4x1xf32>
    %183 = tpu.matmul %182, %142, %cst_81 {dimension_numbers = #tpu.dot_dimension_numbers<[2], [1], [1], [2], [0, 0, 0, 1, 1, 2], [0], [0]>} : vector<1x4x8xf32>, vector<1x8x1xf32>, vector<1x4x1xf32> -> vector<1x4x1xf32>
    "tpu.trace_stop"() : () -> ()
    %184 = vector.extract_strided_slice %8 {offsets = [8, 0], sizes = [4, 1], strides = [1, 1]} : vector<12x1xf32> to vector<4x1xf32>
    %185 = vector.shape_cast %184 : vector<4x1xf32> to vector<1x4x1xf32>
    %186 = arith.addf %183, %185 : vector<1x4x1xf32>
    %187 = math.absf %186 : vector<1x4x1xf32>
    %cst_82 = arith.constant 0.000000e+00 : f32
    %188 = vector.broadcast %cst_82 : f32 to vector<1x4x1xf32>
    %189 = arith.subf %188, %187 : vector<1x4x1xf32>
    %190 = math.exp %189 : vector<1x4x1xf32>
    %cst_83 = arith.constant 1.000000e+00 : f32
    %191 = vector.broadcast %cst_83 : f32 to vector<1x4x1xf32>
    %192 = arith.addf %191, %190 : vector<1x4x1xf32>
    %cst_84 = arith.constant 1.000000e+00 : f32
    %193 = vector.broadcast %cst_84 : f32 to vector<1x4x1xf32>
    %194 = arith.divf %193, %192 : vector<1x4x1xf32>
    %cst_85 = arith.constant 0.000000e+00 : f32
    %195 = vector.broadcast %cst_85 : f32 to vector<1x4x1xf32>
    %196 = arith.cmpf oge, %186, %195 : vector<1x4x1xf32>
    %cst_86 = arith.constant 1.000000e+00 : f32
    %197 = vector.broadcast %cst_86 : f32 to vector<1x4x1xf32>
    %198 = arith.subf %197, %194 : vector<1x4x1xf32>
    %199 = arith.select %196, %194, %198 : vector<1x4x1xi1>, vector<1x4x1xf32>
    %200 = vector.extract_strided_slice %9 {offsets = [0, 0], sizes = [4, 4], strides = [1, 1]} : vector<4x12xf32> to vector<4x4xf32>
    %201 = vector.broadcast %161 : vector<1x4x1xf32> to vector<1x4x256xf32>
    %202 = arith.mulf %98, %201 : vector<1x4x256xf32>
    %203 = vector.shape_cast %200 : vector<4x4xf32> to vector<1x4x4xf32>
    "tpu.trace_start"() <{level = 10 : i32, message = "boc,bcl->bol"}> : () -> ()
    %cst_87 = arith.constant dense<0.000000e+00> : vector<1x4x256xf32>
    %204 = tpu.matmul %203, %202, %cst_87 {dimension_numbers = #tpu.dot_dimension_numbers<[2], [1], [1], [2], [0, 0, 0, 1, 1, 2], [0], [0]>} : vector<1x4x4xf32>, vector<1x4x256xf32>, vector<1x4x256xf32> -> vector<1x4x256xf32>
    "tpu.trace_stop"() : () -> ()
    %205 = vector.extract_strided_slice %9 {offsets = [0, 4], sizes = [4, 4], strides = [1, 1]} : vector<4x12xf32> to vector<4x4xf32>
    %206 = vector.broadcast %180 : vector<1x4x1xf32> to vector<1x4x256xf32>
    %207 = arith.mulf %106, %206 : vector<1x4x256xf32>
    %208 = vector.shape_cast %205 : vector<4x4xf32> to vector<1x4x4xf32>
    "tpu.trace_start"() <{level = 10 : i32, message = "boc,bcl->bol"}> : () -> ()
    %cst_88 = arith.constant dense<0.000000e+00> : vector<1x4x256xf32>
    %209 = tpu.matmul %208, %207, %cst_88 {dimension_numbers = #tpu.dot_dimension_numbers<[2], [1], [1], [2], [0, 0, 0, 1, 1, 2], [0], [0]>} : vector<1x4x4xf32>, vector<1x4x256xf32>, vector<1x4x256xf32> -> vector<1x4x256xf32>
    "tpu.trace_stop"() : () -> ()
    %210 = arith.addf %204, %209 : vector<1x4x256xf32>
    %211 = vector.extract_strided_slice %9 {offsets = [0, 8], sizes = [4, 4], strides = [1, 1]} : vector<4x12xf32> to vector<4x4xf32>
    %212 = vector.broadcast %199 : vector<1x4x1xf32> to vector<1x4x256xf32>
    %213 = arith.mulf %90, %212 : vector<1x4x256xf32>
    %214 = vector.shape_cast %211 : vector<4x4xf32> to vector<1x4x4xf32>
    "tpu.trace_start"() <{level = 10 : i32, message = "boc,bcl->bol"}> : () -> ()
    %cst_89 = arith.constant dense<0.000000e+00> : vector<1x4x256xf32>
    %215 = tpu.matmul %214, %213, %cst_89 {dimension_numbers = #tpu.dot_dimension_numbers<[2], [1], [1], [2], [0, 0, 0, 1, 1, 2], [0], [0]>} : vector<1x4x4xf32>, vector<1x4x256xf32>, vector<1x4x256xf32> -> vector<1x4x256xf32>
    "tpu.trace_stop"() : () -> ()
    %216 = arith.addf %210, %215 : vector<1x4x256xf32>
    %c0_90 = arith.constant 0 : index
    %c0_91 = arith.constant 0 : index
    %217 = vector.load %arg18[%c0_90, %c0_91] : memref<4x1xf32, #tpu.memory_space<vmem>>, vector<4x1xf32>
    %218 = vector.shape_cast %217 : vector<4x1xf32> to vector<1x4x1xf32>
    %219 = vector.broadcast %218 : vector<1x4x1xf32> to vector<1x4x256xf32>
    %220 = arith.addf %216, %219 : vector<1x4x256xf32>
    %c0_92 = arith.constant 0 : index
    %c0_93 = arith.constant 0 : index
    %c0_94 = arith.constant 0 : index
    %221 = vector.load %arg19[%c0_92, %c0_93, %c0_94] : memref<1x4x256xf32, #tpu.memory_space<vmem>>, vector<1x4x256xf32>
    tpu.vector_store %arg19[%c0_92, %c0_93, %c0_94], %220 {strides = array<i32>} : memref<1x4x256xf32, #tpu.memory_space<vmem>>, vector<1x4x256xf32>,
    return
  }
  func.func @transform_0(%arg0: i32) -> (i32, i32, i32) {
    %c0_i32 = arith.constant 0 : i32
    %c0_i32_0 = arith.constant 0 : i32
    %c0_i32_1 = arith.constant 0 : i32
    return %arg0, %c0_i32, %c0_i32_0 : i32, i32, i32
  }
  func.func @transform_1(%arg0: i32) -> (i32, i32, i32) {
    %c0_i32 = arith.constant 0 : i32
    %c0_i32_0 = arith.constant 0 : i32
    %c0_i32_1 = arith.constant 0 : i32
    return %arg0, %c0_i32, %c0_i32_0 : i32, i32, i32
  }
  func.func @transform_2(%arg0: i32) -> (i32, i32) {
    %c0_i32 = arith.constant 0 : i32
    %c0_i32_0 = arith.constant 0 : i32
    %c0_i32_1 = arith.constant 0 : i32
    return %c0_i32, %c0_i32_0 : i32, i32
  }
  func.func @transform_3(%arg0: i32) -> (i32, i32) {
    %c0_i32 = arith.constant 0 : i32
    %c0_i32_0 = arith.constant 0 : i32
    %c0_i32_1 = arith.constant 0 : i32
    return %c0_i32, %c0_i32_0 : i32, i32
  }
  func.func @transform_4(%arg0: i32) -> (i32, i32) {
    %c0_i32 = arith.constant 0 : i32
    %c0_i32_0 = arith.constant 0 : i32
    %c0_i32_1 = arith.constant 0 : i32
    return %c0_i32, %c0_i32_0 : i32, i32
  }
  func.func @transform_5(%arg0: i32) -> (i32, i32) {
    %c0_i32 = arith.constant 0 : i32
    %c0_i32_0 = arith.constant 0 : i32
    %c0_i32_1 = arith.constant 0 : i32
    return %c0_i32, %c0_i32_0 : i32, i32
  }
  func.func @transform_6(%arg0: i32) -> (i32, i32) {
    %c0_i32 = arith.constant 0 : i32
    %c0_i32_0 = arith.constant 0 : i32
    %c0_i32_1 = arith.constant 0 : i32
    return %c0_i32, %c0_i32_0 : i32, i32
  }
  func.func @transform_7(%arg0: i32) -> (i32, i32) {
    %c0_i32 = arith.constant 0 : i32
    %c0_i32_0 = arith.constant 0 : i32
    %c0_i32_1 = arith.constant 0 : i32
    return %c0_i32, %c0_i32_0 : i32, i32
  }
  func.func @transform_8(%arg0: i32) -> (i32, i32) {
    %c0_i32 = arith.constant 0 : i32
    %c0_i32_0 = arith.constant 0 : i32
    %c0_i32_1 = arith.constant 0 : i32
    return %c0_i32, %c0_i32_0 : i32, i32
  }
  func.func @transform_9(%arg0: i32) -> (i32, i32) {
    %c0_i32 = arith.constant 0 : i32
    %c0_i32_0 = arith.constant 0 : i32
    %c0_i32_1 = arith.constant 0 : i32
    return %c0_i32, %c0_i32_0 : i32, i32
  }
  func.func @transform_10(%arg0: i32) -> (i32, i32) {
    %c0_i32 = arith.constant 0 : i32
    %c0_i32_0 = arith.constant 0 : i32
    %c0_i32_1 = arith.constant 0 : i32
    return %c0_i32, %c0_i32_0 : i32, i32
  }
  func.func @transform_11(%arg0: i32) -> (i32, i32) {
    %c0_i32 = arith.constant 0 : i32
    %c0_i32_0 = arith.constant 0 : i32
    %c0_i32_1 = arith.constant 0 : i32
    return %c0_i32, %c0_i32_0 : i32, i32
  }
  func.func @transform_12(%arg0: i32) -> (i32, i32) {
    %c0_i32 = arith.constant 0 : i32
    %c0_i32_0 = arith.constant 0 : i32
    %c0_i32_1 = arith.constant 0 : i32
    return %c0_i32, %c0_i32_0 : i32, i32
  }
  func.func @transform_13(%arg0: i32) -> (i32, i32) {
    %c0_i32 = arith.constant 0 : i32
    %c0_i32_0 = arith.constant 0 : i32
    %c0_i32_1 = arith.constant 0 : i32
    return %c0_i32, %c0_i32_0 : i32, i32
  }
  func.func @transform_14(%arg0: i32) -> (i32, i32) {
    %c0_i32 = arith.constant 0 : i32
    %c0_i32_0 = arith.constant 0 : i32
    %c0_i32_1 = arith.constant 0 : i32
    return %c0_i32, %c0_i32_0 : i32, i32
  }
  func.func @transform_15(%arg0: i32) -> (i32, i32) {
    %c0_i32 = arith.constant 0 : i32
    %c0_i32_0 = arith.constant 0 : i32
    %c0_i32_1 = arith.constant 0 : i32
    return %c0_i32, %c0_i32_0 : i32, i32
  }
  func.func @transform_16(%arg0: i32) -> (i32, i32) {
    %c0_i32 = arith.constant 0 : i32
    %c0_i32_0 = arith.constant 0 : i32
    %c0_i32_1 = arith.constant 0 : i32
    return %c0_i32, %c0_i32_0 : i32, i32
  }
  func.func @transform_17(%arg0: i32) -> (i32, i32) {
    %c0_i32 = arith.constant 0 : i32
    %c0_i32_0 = arith.constant 0 : i32
    %c0_i32_1 = arith.constant 0 : i32
    return %c0_i32, %c0_i32_0 : i32, i32
  }
  func.func @transform_18(%arg0: i32) -> (i32, i32, i32) {
    %c0_i32 = arith.constant 0 : i32
    %c0_i32_0 = arith.constant 0 : i32
    %c0_i32_1 = arith.constant 0 : i32
    return %arg0, %c0_i32, %c0_i32_0 : i32, i32, i32
  }
}

</mosaic_0001>

<bundles_post_ra>
// kernel: tpu_custom_call.1
= control target key start
LH: loop header
LB: loop body
LE: loop exit
PB: predicated region body
PF: predicated region fallthrough
CT: control target
= control target key end

     0   :  { %s2889_s0 = inlined_call_operand.vmem [shape: f32[2,4,256], index: 0, kind: input, shape index: {}]   ;;  %s2890_s1 = inlined_call_operand.vmem [shape: f32[2,4,256], index: 1, kind: input, shape index: {}]   ;;  %s2891_s2 = inlined_call_operand.vmem [shape: f32[8,8], index: 2, kind: input, shape index: {}]   ;;  %s2892_s3 = inlined_call_operand.vmem [shape: f32[8,1], index: 3, kind: input, shape index: {}]   ;;  %s2893_s4 = inlined_call_operand.vmem [shape: f32[8,8], index: 4, kind: input, shape index: {}]   ;;  %s2894_s5 = inlined_call_operand.vmem [shape: f32[8,1], index: 5, kind: input, shape index: {}]   ;;  %s2895_s6 = inlined_call_operand.vmem [shape: f32[4,4], index: 6, kind: input, shape index: {}]   ;;  %s2896_s7 = inlined_call_operand.vmem [shape: f32[4,1], index: 7, kind: input, shape index: {}]   ;;  %s2897_s8 = inlined_call_operand.vmem [shape: f32[4,4], index: 8, kind: input, shape index: {}]   ;;  %s2898_s9 = inlined_call_operand.vmem [shape: f32[4,1], index: 9, kind: input, shape index: {}]   ;;  %s2899_s10 = inlined_call_operand.vmem [shape: f32[4,8], index: 10, kind: input, shape index: {}]   ;;  %s2900_s11 = inlined_call_operand.vmem [shape: f32[4,1], index: 11, kind: input, shape index: {}]   ;;  %s2901_s12 = inlined_call_operand.vmem [shape: f32[8,12], index: 12, kind: input, shape index: {}]   ;;  %s2902_s13 = inlined_call_operand.vmem [shape: f32[8,1], index: 13, kind: input, shape index: {}]   ;;  %s2903_s14 = inlined_call_operand.vmem [shape: f32[12,8], index: 14, kind: input, shape index: {}]   ;;  %s2904_s15 = inlined_call_operand.vmem [shape: f32[12,1], index: 15, kind: input, shape index: {}]   ;;  %s2905_s16 = inlined_call_operand.vmem [shape: f32[4,12], index: 16, kind: input, shape index: {}]   ;;  %s2906_s17 = inlined_call_operand.vmem [shape: f32[4,1], index: 17, kind: input, shape index: {}]   ;;  %s2907_s18 = inlined_call_operand.hbm [shape: f32[2,4,256], index: 18, kind: output, shape index: {}]  }
   0x1   :  { %2917 = sst [smem:[#allocation12_spill]] %s2889_s0 }
   0x2   :  { %2918 = sst [smem:[#allocation13_spill]] %s2890_s1 }
   0x3   :  { %2919 = sst [smem:[#allocation14_spill]] %s2891_s2 }
   0x4   :  { %2920 = sst [smem:[#allocation15_spill]] %s2907_s18 }
   0x5   :  { %23 = vsyncpa [#allocation3], 0 }
   0x6   :  { %25 = vsyncpa [#allocation3 + $0x1], 0  ;;  %s2597_s27 = smov 0   ;;  %s2599_s28 = smov 0  }
   0x7   :  { %s2601_s29 = smov 0   ;;  %s2603_s30 = smov 0  }
   0x8 LB: > { %2921 = sst [smem:[#allocation5_spill]] %s2481_s27  ;;  %s2618_s0 = sadd.s32 4294967295, %s2493_s30   ;;  %s2493_s30 = sphi %s2603_s30, %s2939_s30   ;;  %s2489_s29 = sphi %s2601_s29, %s2941_s29   ;;  %s2485_s28 = sphi %s2599_s28, %s2943_s28   ;;  %s2481_s27 = sphi %s2597_s27, %s2942_s27  }
   0x9   : > { %2922 = sst [smem:[#allocation6_spill]] %s2489_s29  ;;  %s2221_s19 = sadd.s32 4294967294, %s2493_s30  }
   0xa   : > { %2923 = sst [smem:[#allocation7_spill]] %s2493_s30  ;;  %s2622_s1 = sadd.s32 1, %s2493_s30  }
   0xb   : > { %2924 = sst [smem:[#allocation8_spill]] %s2622_s1  ;;  %s426_s20 = sadd.s32 1, %s2489_s29 }
   0xc   : > { %s423_s21 = ssub.s32 %s2493_s30, %s2622_s1  ;;  %p436_p0 = scmp.ne.s32.totalorder %s2489_s29, %s2485_s28 }
   0xd   : > { %p424_p1 = scmp.eq.s32.totalorder %s423_s21, 0  ;;  %p437_p2 = scmp.eq.s32.totalorder %s2618_s0, 1 }
   0xe   : > { %p442_p3 = scmp.ne.s32.totalorder %s2485_s28, %s2481_s27  ;;  %p443_p4 = scmp.eq.s32.totalorder %s2221_s19, 1 }
   0xf   : > { %s2633_s22 = scalar_select %p424_p1, %s2489_s29, %s426_s20  }
  0x10   : > { %p2635_p5 = por %p437_p2, %p436_p0  ;;  %p2639_p6 = por %p443_p4, %p442_p3 }
  0x11   : > { %2925 = sst [smem:[#allocation9_spill]] %s2633_s22  ;;  %p2224_p7 = scmp.ge.s32.totalorder %s2493_s30, 1 }
  0x12   : > { %s2926_s2 = scalar_select %p2635_p5, 1, 0 }
  0x13   : > { %s2928_s23 = scalar_select %p2639_p6, 1, 0 }
  0x14   : > { %2927 = sst [smem:[#allocation10_spill]] %s2926_s2  ;;  %p525_p8 = scmp.lt.s32.totalorder %s2493_s30, 3 }
  0x15   : > { %2929 = sst [smem:[#allocation11_spill]] %s2928_s23 }
  0x16   : > { %p526_p9 = pnand %p2224_p7, %p525_p8 }
  0x17   : > { %p584_p10 = scmp.lt.s32.totalorder (!%p526_p9), %s2618_s0, 1  ;;  %s2930_s26 = sld [smem:[#allocation14_spill]] (!%p526_p9)  ;;  %vm609_vm0 = vcmask (!%p526_p9), 1043456   ;;  %v2496_v11 = vmov (!%p526_p9), 0.0   ;;  %vm2497_vm1 = vmmov (!%p526_p9), 0   ;;  %vm628_vm2 = vcmask (!%p526_p9), 31744  }
  0x18   : > { %529 = sbr.rel (%p526_p9) target bundleno = 2113 (0x841), region = 92  ;;  %s2495_s19 = smov (!%p526_p9), 124   ;;  %2294 = vmatprep.subr.mxu1 (!%p526_p9), %v2496_v11  ;;  %2296 = vmatprep.mubr.msk.f32.mxu1 (!%p526_p9), %vm2497_vm1, %v2496_v11  ;;  %v779_v20 = vld [vmem:[%s2892_s3] sm:$0xff] (!%p526_p9)  ;;  %vm798_vm4 = vcmask (!%p526_p9), 64512   ;;  %v2498_v44 = vmov (!%p526_p9), 0  }
  0x19   : > { %s2931_s1 = sld [smem:[#allocation13_spill]] (!%p526_p9)  ;;  %s2932_s18 = sld [smem:[#allocation12_spill]] (!%p526_p9)  ;;  %2304 = vmatprep.subr.mxu0 (!%p526_p9), %v2496_v11  ;;  %2306 = vmatprep.mubr.msk.f32.mxu0 (!%p526_p9), %vm2497_vm1, %v2496_v11  ;;  %v597_v38 = vld [vmem:[%s2893_s4] sm:$0xff] (!%p526_p9) }
  0x1a   : > { %v882_v40 = vrot.slane (!%p526_p9), %v597_v38, 4  ;;  %v1163_v42 = vld [vmem:[%s2895_s6] sm:$0xf] (!%p526_p9)  ;;  %2396 = vset.pattern.permute.xlu0 (!%p526_p9), %v2498_v44  ;;  %2395 = vset.pattern.permute.xlu1 (!%p526_p9), %v2498_v44  ;;  %s2934_s30 = sld [smem:[#allocation15_spill]] (!%p526_p9) }
  0x1b   : > { %v1250_v43 = vld [vmem:[%s2897_s8] sm:$0xf] (!%p526_p9) }
  0x1c   : > { %v598_v45 = vld [vmem:[%s2894_s5] sm:$0xff] (!%p526_p9) }
  0x1d   : > { %v596_v0 = vld [vmem:[%s2930_s26] sm:$0xff] (!%p526_p9)  ;;  %v884_v46 = vrot.slane (!%p526_p9), %v598_v45, 4 }
  0x1e   : > { %626 = vrot.lane.b32.xlu1 (!%p526_p9), %v596_v0, %s2495_s19 }
  0x1f   : > { %s585_s20 = scalar_select %p584_p10, %s2618_s0, 1 }
  0x21   : > { %s2271_s21 = sshll.u32 %s585_s20, 3  ;;  %s2273_s20 = sshll.u32 %s2618_s0, 7 }
  0x22   : > { %s593_s23 = scalar_lea.vmem %s2931_s1, %s2271_s21  ;;  %s588_s2 = scalar_lea.vmem %s2932_s18, %s2271_s21 }
  0x23   : > { %v2657_v1 = vld [vmem:[%s593_s23] sm:$0xff]  ;;  %s2500_s23 = smov 120   ;;  %s2935_s1 = smov %s2934_s30 }
  0x24   : > { %v2659_v2 = vld [vmem:[%s588_s2] sm:$0xff]  ;;  %v2663_v3 = vcombine.high %v2657_v1, %v2657_v1  ;;  %v619_v4 = vsel %vm609_vm0, %v2657_v1, 0.0  ;;  %s2847_s22 = scalar_lea.hbm %s2934_s30, %s2273_s20  ;;  %s2501_s0 = smov [#allocation2]  }
  0x25   : > { %v607_v5 = vcombine.high %v2659_v2, %v2659_v2  ;;  %v610_v7 = vsel %vm609_vm0, %v2659_v2, 0.0  ;;  %s2435_s25 = sshll.u32 %s2501_s0, 4  ;;  %s2436_s25 = int_to_ptr.vmem [resolvable:$false] %s2435_s25 }
  0x26   : > { %v620_v6 = vsel %vm609_vm0, %v2663_v3, 0.0 }
  0x27   : > { %v611_v8 = vsel %vm609_vm0, %v607_v5, 0.0  ;;  %v621_v9 = vadd.f32 %v620_v6, %v619_v4 }
  0x28   : > { %v612_v10 = vadd.f32 %v611_v8, %v610_v7  ;;  %v599_v7 = vld [vmem:[%s2899_s10] sm:$0xf] }
  0x29   : > { %622 = vadd.xlane.f32.xlu0 %v621_v9  ;;  %v1155_v8 = vld [vmem:[%s2900_s11] sm:$0xf] }
  0x2d   : > { %613 = vadd.xlane.f32.xlu0 %v612_v10  ;;  %v1251_v10 = vld [vmem:[%s2898_s9] sm:$0xf] }
  0x90   : > { %v627_v14 = vpop.permute.xlu1 %626 }
  0xb6   : > { %v623_v12 = vpop.xlane.xlu0 %622 }
  0xb7   : > { %v624_v13 = vmul.f32 0.00390625, %v623_v12 }
  0xb9   : > { %2295 = vmatpush3.msk.msra.mxu1 %vm609_vm0, %v624_v13 }
  0xba   : > { %2297 = vmatmul.mubr.msk.f32.vlgmr.msra.gmra.mrb[0].mxu1 %vm628_vm2, %v627_v14  ;;  %v614_v15 = vpop.xlane.xlu0 %613  ;;  %2299 = vmatprep.subr.mxu1 %v2496_v11 }
  0xbb   : > { %v615_v16 = vmul.f32 0.00390625, %v614_v15  ;;  %2301 = vmatprep.mubr.msk.f32.mxu1 %vm2497_vm1, %v2496_v11  ;;  %v1164_v15 = vld [vmem:[%s2896_s7] sm:$0xf] }
  0xbd   : > { %2300 = vmatpush3.msk.msra.mxu1 %vm609_vm0, %v615_v16  ;;  %v2499_v16 = vmov 839922192  }
  0xbe   : > { %2302 = vmatmul.mubr.msk.f32.vlgmr.msra.gmra.mrb[2].mxu1 %vm628_vm2, %v596_v0  ;;  %2309 = vmatprep.subr.mxu1 %v2496_v11 }
  0xbf   : > { %2311 = vmatprep.mubr.msk.f32.mxu1 %vm2497_vm1, %v2496_v11 }
 0x18d   : > { %v700_v17 = vpop.f32.mrb[0].mxu1 }
 0x18e   : > { %v2298_v18 = vpop.f32.mrb[1].mxu1 }
 0x18f   : > { %v975_v18 = vlaneseq }
 0x191   : > { %v775_v19 = vpop.f32.mrb[2].mxu1 }
 0x192   : > { %v776_v21 = vadd.f32 %v775_v19, %v700_v17  ;;  %v2303_v22 = vpop.f32.mrb[3].mxu1  ;;  %v973_v17 = vunpack.c.l.s4 %v2499_v16 }
 0x194   : > { %v780_v23 = vadd.f32 %v779_v20, %v776_v21  ;;  %v974_v19 = vunpack.c.0.s8 %v973_v17  ;;  %v976_v20 = vshrl.u32 %v975_v18, 7 }
 0x196   : > { %v782_v24 = vand.u32 2147483647, %v780_v23  ;;  %v781_v35 = vmax.f32 %v780_v23, 0.0  ;;  %v977_v21 = vsub.s32 %v974_v19, %v976_v20 }
 0x198   : > { %v783_v25 = vsub.f32 0.0, %v782_v24 }
 0x19a   : > { %v784_v26 = vmul.f32 1.442695, %v783_v25 }
 0x19c   : > { %2399 = vpow2.f32 %v784_v26 }
 0x1a6   : > { %v2400_v27 = vpop.eup %2399 }
 0x1a7   : > { %v786_v28 = vadd.f32 1.0, %v2400_v27  ;;  %v789_v29 = vmul.f32 -0.5, %v2400_v27  ;;  %v792_v31 = vand.u32 2147483647, %v2400_v27 }
 0x1a9   : > { %2401 = vlog2.f32 %v786_v28  ;;  %v790_v30 = vadd.f32 1.0, %v789_v29  ;;  %vm793_vm3 = vcmp.lt.f32.partialorder %v792_v31, 0.0004427343 }
 0x1ab   : > { %v791_v34 = vmul.f32 %v2400_v27, %v790_v30 }
 0x1b3   : > { %v2402_v32 = vpop.eup %2401 }
 0x1b4   : > { %v788_v33 = vmul.f32 0.6931472, %v2402_v32 }
 0x1b6   : > { %v794_v36 = vsel %vm793_vm3, %v791_v34, %v788_v33 }
 0x1b7   : > { %v795_v37 = vadd.f32 %v794_v36, %v781_v35 }
 0x1b9   : > { %2403 = vtanh.f32 %v795_v37 }
 0x1c3   : > { %v2404_v39 = vpop.eup %2403 }
 0x1c4   : > { %v797_v41 = vmul.f32 %v2404_v39, %v780_v23 }
 0x1c6   : > { %2305 = vmatpush3.msra.mxu0 %v797_v41  ;;  %2310 = vmatpush3.msra.mxu1 %v797_v41 }
 0x1c7   : > { %2307 = vmatmul.mubr.msk.f32.vlgmr.msra.gmra.mrb[0].mxu0 %vm798_vm4, %v597_v38  ;;  %2312 = vmatmul.mubr.msk.f32.vlgmr.msra.gmra.mrb[4].mxu1 %vm798_vm4, %v882_v40 }
 0x1c8   : > { %2242 = vmatprep.subr.msk.mxu1 %vm609_vm0, %v607_v5  ;;  %1241 = vmatprep.mubr.f32.mxu1 %v2496_v11 }
 0x1c9   : > { %2243 = vmatpush1.msk.msra.mxu1 %vm609_vm0, %v2659_v2  ;;  %1069 = vmatprep.mubr.f32.mxu0 %v2496_v11 }
 0x1ca   : > { %2245 = vmatprep.subr.msk.mxu1 %vm609_vm0, %v2663_v3 }
 0x1cb   : > { %2244 = vmatmul.mubr.msk.f32.vlgmr.msra.gmra.mrb[6].mxu1 %vm628_vm2, %v1163_v42 }
 0x1cc   : > { %2246 = vmatpush1.msk.msra.mxu1 %vm609_vm0, %v2657_v1  ;;  %1328 = vmatprep.mubr.f32.mxu1 %v2496_v11 }
 0x1cd   : > { %2319 = vmatprep.subr.mxu1 %v2496_v11 }
 0x1cf   : > { %2247 = vmatmul.mubr.msk.f32.vlgmr.msra.gmra.mrb[8].mxu1 %vm628_vm2, %v1250_v43 }
 0x1d0   : > { %2321 = vmatprep.mubr.msk.f32.mxu1 %vm2497_vm1, %v2496_v11 }
 0x29a   : > { %v868_v47 = vpop.f32.mrb[0].mxu0  ;;  %v954_v48 = vpop.f32.mrb[4].mxu1 }
 0x29b   : > { %v869_v49 = vadd.f32 %v868_v47, %v598_v45  ;;  %v955_v50 = vadd.f32 %v954_v48, %v884_v46  ;;  %v2313_v51 = vpop.f32.mrb[5].mxu1  ;;  %v2308_v52 = vpop.f32.mrb[1].mxu0 }
 0x29d   : > { %v872_v53 = vand.u32 2147483647, %v869_v49  ;;  %v958_v54 = vand.u32 2147483647, %v955_v50  ;;  %vm879_vm5 = vcmp.ge.f32.partialorder %v869_v49, 0.0  ;;  %vm965_vm6 = vcmp.ge.f32.partialorder %v955_v50, 0.0 }
 0x29e   : > { %v1243_v9 = vpop.f32.mrb[6].mxu1 }
 0x29f   : > { %v873_v55 = vsub.f32 0.0, %v872_v53  ;;  %v959_v56 = vsub.f32 0.0, %v958_v54  ;;  %v1245_v12 = vpop.f32.mrb[7].mxu1  ;;  %v600_v53 = vld [vmem:[%s2901_s12] sm:$0xff] }
 0x2a1   : > { %v874_v57 = vmul.f32 1.442695, %v873_v55  ;;  %v960_v58 = vmul.f32 1.442695, %v959_v56 }
 0x2a2   : > { %v1330_v13 = vpop.f32.mrb[8].mxu1 }
 0x2a3   : > { %2405 = vpow2.f32 %v874_v57  ;;  %v1332_v14 = vpop.f32.mrb[9].mxu1 }
 0x2a4   : > { %2407 = vpow2.f32 %v960_v58 }
 0x2ad   : > { %v2406_v59 = vpop.eup %2405 }
 0x2ae   : > { %v2408_v60 = vpop.eup %2407  ;;  %v876_v61 = vadd.f32 1.0, %v2406_v59 }
 0x2af   : > { %v962_v62 = vadd.f32 1.0, %v2408_v60 }
 0x2b0   : > { %2409 = vrcp.f32 %v876_v61 }
 0x2b1   : > { %2411 = vrcp.f32 %v962_v62 }
 0x2ba   : > { %v2410_v63 = vpop.eup %2409 }
 0x2bb   : > { %v2412_v0 = vpop.eup %2411  ;;  %v880_v3 = vsub.f32 1.0, %v2410_v63 }
 0x2bc   : > { %v966_v4 = vsub.f32 1.0, %v2412_v0 }
 0x2bd   : > { %v881_v5 = vsel %vm879_vm5, %v2410_v63, %v880_v3 }
 0x2be   : > { %970 = vperm.xlu0 %2396, %v881_v5   ;;  %v967_v6 = vsel %vm965_vm6, %v2412_v0, %v966_v4 }
 0x2bf   : > { %983 = vperm.xlu1 %2395, %v967_v6   ;;  %v1586_v6 = vld [vmem:[%s2902_s13] sm:$0xff] }
 0x2c3   : > { %995 = vrot.lane.b32.xlu1 %v599_v7, %s2495_s19 }
 0x2c7   : > { %1158 = vperm.xlu1 %2395, %v1155_v8  }
 0x2cb   : > { %1254 = vperm.xlu1 %2395, %v1251_v10  }
 0x2cf   : > { %1167 = vperm.xlu1 %2395, %v1164_v15  }
 0x33d   : > { %v971_v22 = vpop.permute.xlu0 %970 }
 0x33e   : > { %v978_v23 = vrot.slane %v971_v22, %v977_v21  ;;  %v984_v24 = vpop.permute.xlu1 %983 }
 0x33f   : > { %v991_v25 = vrot.slane %v984_v24, %v977_v21 }
 0x340   : > { %v980_v26 = vmul.f32 %v978_v23, %v2659_v2 }
 0x341   : > { %v993_v27 = vmul.f32 %v991_v25, %v2657_v1  ;;  %v601_v25 = vld [vmem:[%s2903_s14] sm:$0xff] }
 0x342   : > { %v1077_v29 = vcombine.high %v980_v26, %v980_v26  ;;  %v996_v30 = vpop.permute.xlu1 %995 }
 0x343   : > { %v998_v28 = vcombine.high %v993_v27, %v993_v27 }
 0x345   : > { %2236 = vmatprep.subr.msk.mxu0 %vm609_vm0, %v998_v28 }
 0x346   : > { %2237 = vmatpush1.msk.msra.mxu0 %vm609_vm0, %v993_v27  ;;  %v1159_v1 = vpop.permute.xlu1 %1158  ;;  %v1688_v27 = vrot.slane %v601_v25, 4 }
 0x347   : > { %2238 = vmatmul.mubr.msk.f32.vlgmr.msra.gmra.mrb[2].mxu0 %vm628_vm2, %v996_v30  ;;  %2239 = vmatprep.subr.msk.mxu0 %vm609_vm0, %v1077_v29  ;;  %v602_v29 = vld [vmem:[%s2903_s14 + $0x8] sm:$0xf]  ;;  %v603_v30 = vld [vmem:[%s2904_s15] sm:$0xff] }
 0x348   : > { %2240 = vmatpush1.msk.msra.mxu0 %vm609_vm0, %v980_v26  ;;  %1148 = vmatprep.mubr.f32.mxu0 %v2496_v11 }
 0x349   : > { %2314 = vmatprep.subr.mxu0 %v2496_v11 }
 0x34a   : > { %v1255_v2 = vpop.permute.xlu1 %1254 }
 0x34b   : > { %v1331_v33 = vadd.f32 %v1330_v13, %v1255_v2  ;;  %v1333_v37 = vadd.f32 %v1332_v14, %v1255_v2 }
 0x34e   : > { %v1168_v31 = vpop.permute.xlu1 %1167 }
 0x34f   : > { %2241 = vmatmul.mubr.msk.f32.vlgmr.msra.gmra.mrb[2].mxu0 %vm628_vm2, %v599_v7  ;;  %v1244_v34 = vadd.f32 %v1243_v9, %v1168_v31  ;;  %v1246_v38 = vadd.f32 %v1245_v12, %v1168_v31 }
 0x350   : > { %2316 = vmatprep.mubr.msk.f32.mxu0 %vm2497_vm1, %v2496_v11 }
 0x422   : > { %v1150_v32 = vpop.f32.mrb[2].mxu0 }
 0x423   : > { %v2747_v35 = vadd.f32 %v1159_v1, %v1150_v32  ;;  %v1152_v36 = vpop.f32.mrb[3].mxu0 }
 0x424   : > { %v2749_v39 = vadd.f32 %v1159_v1, %v1152_v36  ;;  %v1690_v1 = vrot.slane %v603_v30, 4 }
 0x425   : > { %v2752_v40 = vmul.f32 %v1331_v33, %v2747_v35  ;;  %v2755_v41 = vmul.f32 %v1244_v34, %v2747_v35  ;;  %v1349_v50 = vsel %vm609_vm0, %v2747_v35, 0.0 }
 0x426   : > { %v2758_v42 = vmul.f32 %v1333_v37, %v2749_v39  ;;  %v2761_v43 = vmul.f32 %v1246_v38, %v2749_v39  ;;  %v1350_v51 = vsel %vm609_vm0, %v2749_v39, 0.0  ;;  %v604_v37 = vld [vmem:[%s2904_s15 + $0x8] sm:$0xf] }
 0x427   : > { %v1343_v44 = vsel %vm609_vm0, %v2752_v40, 0.0  ;;  %v1337_v45 = vsel %vm609_vm0, %v2755_v41, 0.0  ;;  %v1351_v52 = vadd.f32 %v1350_v51, %v1349_v50 }
 0x428   : > { %v1344_v46 = vsel %vm609_vm0, %v2758_v42, 0.0  ;;  %v1338_v47 = vsel %vm609_vm0, %v2761_v43, 0.0 }
 0x429   : > { %v1345_v48 = vadd.f32 %v1344_v46, %v1343_v44  ;;  %v1339_v49 = vadd.f32 %v1338_v47, %v1337_v45 }
 0x42b   : > { %1346 = vadd.xlane.f32.xlu1 %v1345_v48  ;;  %1340 = vadd.xlane.f32.xlu0 %v1339_v49 }
 0x42f   : > { %1352 = vadd.xlane.f32.xlu1 %v1351_v52 }
 0x440   : > { %1356 = vrot.lane.b32.xlu1 %v600_v53, %s2495_s19 }
 0x444   : > { %1508 = vrot.lane.b32.xlu1 %v600_v53, %s2500_s23 }
 0x4b8   : > { %v1347_v54 = vpop.xlane.xlu1 %1346  ;;  %v1341_v55 = vpop.xlane.xlu0 %1340 }
 0x4b9   : > { %v1348_v56 = vmul.f32 0.00390625, %v1347_v54  ;;  %v1342_v57 = vmul.f32 0.00390625, %v1341_v55 }
 0x4bb   : > { %2315 = vmatpush3.msk.msra.mxu0 %vm609_vm0, %v1348_v56  ;;  %2320 = vmatpush3.msk.msra.mxu1 %vm609_vm0, %v1342_v57 }
 0x4bc   : > { %v1353_v58 = vpop.xlane.xlu1 %1352  ;;  %2324 = vmatprep.subr.mxu0 %v2496_v11  ;;  %2322 = vmatmul.mubr.msk.f32.vlgmr.msra.gmra.mrb[10].mxu1 %vm628_vm2, %v600_v53 }
 0x4bd   : > { %2329 = vmatprep.subr.mxu1 %v2496_v11  ;;  %2331 = vmatprep.mubr.msk.f32.mxu1 %vm2497_vm1, %v2496_v11  ;;  %v1354_v59 = vmul.f32 0.00390625, %v1353_v58 }
 0x4c0   : > { %v1357_v60 = vpop.permute.xlu1 %1356 }
 0x4c1   : > { %2317 = vmatmul.mubr.msk.f32.vlgmr.msra.gmra.mrb[4].mxu0 %vm628_vm2, %v1357_v60 }
 0x4c2   : > { %2325 = vmatpush3.msk.msra.mxu0 %vm609_vm0, %v1354_v59  ;;  %2326 = vmatprep.mubr.msk.f32.mxu0 %vm2497_vm1, %v2496_v11 }
 0x4c3   : > { %2334 = vmatprep.subr.mxu0 %v2496_v11 }
 0x4c4   : > { %v1509_v61 = vpop.permute.xlu1 %1508 }
 0x4c5   : > { %2327 = vmatmul.mubr.msk.f32.vlgmr.msra.gmra.mrb[6].mxu0 %vm628_vm2, %v1509_v61 }
 0x4c6   : > { %2336 = vmatprep.mubr.msk.f32.mxu0 %vm2497_vm1, %v2496_v11 }
 0x58f   : > { %v1504_v62 = vpop.f32.mrb[10].mxu1 }
 0x590   : > { %v2323_v63 = vpop.f32.mrb[11].mxu1 }
 0x594   : > { %v1429_v0 = vpop.f32.mrb[4].mxu0 }
 0x595   : > { %v1505_v3 = vadd.f32 %v1504_v62, %v1429_v0  ;;  %v2318_v4 = vpop.f32.mrb[5].mxu0 }
 0x598   : > { %v1581_v5 = vpop.f32.mrb[6].mxu0 }
 0x599   : > { %v1585_v7 = vadd.f32 %v1581_v5, %v1505_v3  ;;  %v2328_v8 = vpop.f32.mrb[7].mxu0 }
 0x59b   : > { %v1587_v9 = vadd.f32 %v1586_v6, %v1585_v7  ;;  %v605_v6 = vld [vmem:[%s2905_s16] sm:$0xf] }
 0x59d   : > { %v1589_v10 = vand.u32 2147483647, %v1587_v9  ;;  %v1588_v22 = vmax.f32 %v1587_v9, 0.0 }
 0x59f   : > { %v1590_v12 = vsub.f32 0.0, %v1589_v10 }
 0x5a1   : > { %v1591_v13 = vmul.f32 1.442695, %v1590_v12 }
 0x5a3   : > { %2413 = vpow2.f32 %v1591_v13 }
 0x5ad   : > { %v2414_v14 = vpop.eup %2413 }
 0x5ae   : > { %v1593_v15 = vadd.f32 1.0, %v2414_v14  ;;  %v1596_v16 = vmul.f32 -0.5, %v2414_v14  ;;  %v1599_v18 = vand.u32 2147483647, %v2414_v14 }
 0x5b0   : > { %2415 = vlog2.f32 %v1593_v15  ;;  %v1597_v17 = vadd.f32 1.0, %v1596_v16  ;;  %vm1600_vm7 = vcmp.lt.f32.partialorder %v1599_v18, 0.0004427343 }
 0x5b2   : > { %v1598_v21 = vmul.f32 %v2414_v14, %v1597_v17 }
 0x5ba   : > { %v2416_v19 = vpop.eup %2415 }
 0x5bb   : > { %v1595_v20 = vmul.f32 0.6931472, %v2416_v19 }
 0x5bd   : > { %v1601_v23 = vsel %vm1600_vm7, %v1598_v21, %v1595_v20 }
 0x5be   : > { %v1602_v24 = vadd.f32 %v1601_v23, %v1588_v22 }
 0x5c0   : > { %2417 = vtanh.f32 %v1602_v24 }
 0x5ca   : > { %v2418_v26 = vpop.eup %2417 }
 0x5cb   : > { %v1604_v28 = vmul.f32 %v2418_v26, %v1587_v9  ;;  %v2122_v9 = vld [vmem:[%s2906_s17] sm:$0xf] }
 0x5cd   : > { %2330 = vmatpush3.msra.mxu1 %v1604_v28  ;;  %2335 = vmatpush3.msra.mxu0 %v1604_v28 }
 0x5ce   : > { %2332 = vmatmul.mubr.msk.f32.vlgmr.msra.gmra.mrb[12].mxu1 %vm798_vm4, %v601_v25  ;;  %2337 = vmatmul.mubr.msk.f32.vlgmr.msra.gmra.mrb[8].mxu0 %vm798_vm4, %v1688_v27 }
 0x5cf   : > { %2339 = vmatprep.subr.mxu1 %v2496_v11  ;;  %2341 = vmatprep.mubr.msk.f32.mxu1 %vm2497_vm1, %v2496_v11 }
 0x5d0   : > { %2340 = vmatpush3.msra.mxu1 %v1604_v28  ;;  %1946 = vmatprep.mubr.f32.mxu0 %v2496_v11 }
 0x5d2   : > { %2342 = vmatmul.mubr.msk.f32.vlgmr.msra.gmra.mrb[14].mxu1 %vm798_vm4, %v602_v29 }
 0x6a1   : > { %v1674_v2 = vpop.f32.mrb[12].mxu1  ;;  %v1760_v31 = vpop.f32.mrb[8].mxu0 }
 0x6a2   : > { %v1675_v32 = vadd.f32 %v1674_v2, %v603_v30  ;;  %v1761_v33 = vadd.f32 %v1760_v31, %v1690_v1  ;;  %v2338_v34 = vpop.f32.mrb[9].mxu0  ;;  %v2333_v36 = vpop.f32.mrb[13].mxu1 }
 0x6a4   : > { %v1678_v38 = vand.u32 2147483647, %v1675_v32  ;;  %v1764_v44 = vand.u32 2147483647, %v1761_v33  ;;  %vm1685_vm8 = vcmp.ge.f32.partialorder %v1675_v32, 0.0  ;;  %vm1771_vm9 = vcmp.ge.f32.partialorder %v1761_v33, 0.0 }
 0x6a5   : > { %v1843_v45 = vpop.f32.mrb[14].mxu1 }
 0x6a6   : > { %v1679_v46 = vsub.f32 0.0, %v1678_v38  ;;  %v1765_v47 = vsub.f32 0.0, %v1764_v44  ;;  %v1844_v48 = vadd.f32 %v1843_v45, %v604_v37  ;;  %v2343_v49 = vpop.f32.mrb[15].mxu1 }
 0x6a8   : > { %v1680_v50 = vmul.f32 1.442695, %v1679_v46  ;;  %v1766_v51 = vmul.f32 1.442695, %v1765_v47  ;;  %v1847_v52 = vand.u32 2147483647, %v1844_v48 }
 0x6a9   : > { %vm1854_vm10 = vcmp.ge.f32.partialorder %v1844_v48, 0.0 }
 0x6aa   : > { %2419 = vpow2.f32 %v1680_v50  ;;  %v1848_v53 = vsub.f32 0.0, %v1847_v52 }
 0x6ab   : > { %2421 = vpow2.f32 %v1766_v51 }
 0x6ac   : > { %v1849_v54 = vmul.f32 1.442695, %v1848_v53 }
 0x6ae   : > { %2423 = vpow2.f32 %v1849_v54 }
 0x6b4   : > { %v2420_v55 = vpop.eup %2419 }
 0x6b5   : > { %v2422_v56 = vpop.eup %2421  ;;  %v1682_v57 = vadd.f32 1.0, %v2420_v55 }
 0x6b6   : > { %v1768_v58 = vadd.f32 1.0, %v2422_v56 }
 0x6b7   : > { %2425 = vrcp.f32 %v1682_v57 }
 0x6b8   : > { %v2424_v59 = vpop.eup %2423  ;;  %2427 = vrcp.f32 %v1768_v58 }
 0x6b9   : > { %v1851_v60 = vadd.f32 1.0, %v2424_v59 }
 0x6bb   : > { %2429 = vrcp.f32 %v1851_v60 }
 0x6c1   : > { %v2426_v61 = vpop.eup %2425 }
 0x6c2   : > { %v2428_v62 = vpop.eup %2427  ;;  %v1686_v63 = vsub.f32 1.0, %v2426_v61 }
 0x6c3   : > { %v1772_v0 = vsub.f32 1.0, %v2428_v62 }
 0x6c4   : > { %v1687_v3 = vsel %vm1685_vm8, %v2426_v61, %v1686_v63 }
 0x6c5   : > { %v2430_v4 = vpop.eup %2429  ;;  %v1773_v5 = vsel %vm1771_vm9, %v2428_v62, %v1772_v0  ;;  %1859 = vperm.xlu1 %2395, %v1687_v3  }
 0x6c6   : > { %1866 = vperm.xlu0 %2396, %v1773_v5   ;;  %v1855_v7 = vsub.f32 1.0, %v2430_v4 }
 0x6c8   : > { %v1856_v8 = vsel %vm1854_vm10, %v2430_v4, %v1855_v7 }
 0x6c9   : > { %1872 = vrot.lane.b32.xlu1 %v605_v6, %s2495_s19  ;;  %s581_s19 = sand.u32 1, %s2485_s28  }
 0x6ca   : > { %s2136_s2 = scalar_lea.sflag [#allocation3], %s581_s19 }
 0x6cd   : > { %2034 = vperm.xlu1 %2395, %v1856_v8  }
 0x6d1   : > { %2039 = vrot.lane.b32.xlu1 %v605_v6, %s2500_s23  ;;  %s2225_s23 = sshll.u32 %s581_s19, 3 }
 0x6d2   : > { %s583_s21 = scalar_lea.vmem [#allocation2], %s2225_s23  ;;  %s2437_s23 = scalar_lea.vmem %s2436_s25, 256 }
 0x6d3   : > { %s2150_s18 = sshll.u32 %s583_s21, 4  ;;  %s2849_s18 = int_to_ptr.vmem [resolvable:$true] %s2150_s18 }
 0x6d4   : > { %s2431_s24 = scalar_lea.vmem %s2849_s18, 128  ;;  %p2438_p0 = scmp.lt.s32.totalorder %s2849_s18, %s2436_s25 }
 0x6d5   : > { %2125 = vperm.xlu1 %2395, %v2122_v9   ;;  %p2432_p11 = scmp.ne.s32.totalorder %s2849_s18, %s2431_s24  ;;  %p2439_p1 = scmp.lt.s32.totalorder %s2437_s23, %s2431_s24 }
 0x6d7   : > { %p2433_p12 = pnand %p2432_p11, %p2635_p5  ;;  %p2440_p2 = por %p2439_p1, %p2438_p0 }
 0x6d9   : > { %p2434_p13 = pneg %p2433_p12 }
 0x6db   : > { %p2441_p3 = pnand %p2440_p2, %p2434_p13 }
 0x744   : > { %v1860_v10 = vpop.permute.xlu1 %1859 }
 0x745   : > { %v1867_v12 = vpop.permute.xlu0 %1866  ;;  %v1863_v15 = vmul.f32 %v1860_v10, %v2761_v43  ;;  %v1862_v17 = vmul.f32 %v1860_v10, %v2755_v41 }
 0x746   : > { %v1869_v13 = vmul.f32 %v1867_v12, %v2752_v40  ;;  %v1870_v14 = vmul.f32 %v1867_v12, %v2758_v42 }
 0x748   : > { %2257 = vmatprep.subr.msk.mxu0 %vm609_vm0, %v1870_v14  ;;  %v1873_v16 = vpop.permute.xlu1 %1872 }
 0x749   : > { %2258 = vmatpush1.msk.msra.mxu0 %vm609_vm0, %v1869_v13 }
 0x74a   : > { %2259 = vmatmul.mubr.msk.f32.vlgmr.msra.gmra.mrb[10].mxu0 %vm628_vm2, %v1873_v16  ;;  %2260 = vmatprep.subr.msk.mxu0 %vm609_vm0, %v1863_v15 }
 0x74b   : > { %2261 = vmatpush1.msk.msra.mxu0 %vm609_vm0, %v1862_v17  ;;  %2025 = vmatprep.mubr.f32.mxu0 %v2496_v11 }
 0x74c   : > { %v2035_v40 = vpop.permute.xlu1 %2034 }
 0x74d   : > { %v2038_v42 = vmul.f32 %v2035_v40, %v2749_v39  ;;  %v2037_v43 = vmul.f32 %v2035_v40, %v2747_v35 }
 0x74f   : > { %2263 = vmatprep.subr.msk.mxu0 %vm609_vm0, %v2038_v42 }
 0x750   : > { %v2040_v41 = vpop.permute.xlu1 %2039 }
 0x752   : > { %2262 = vmatmul.mubr.msk.f32.vlgmr.msra.gmra.mrb[10].mxu0 %vm628_vm2, %v605_v6 }
 0x753   : > { %2264 = vmatpush1.msk.msra.mxu0 %vm609_vm0, %v2037_v43  ;;  %2113 = vmatprep.mubr.f32.mxu0 %v2496_v11 }
 0x754   : > { %v2126_v18 = vpop.permute.xlu1 %2125 }
 0x75a   : > { %2265 = vmatmul.mubr.msk.f32.vlgmr.msra.gmra.mrb[10].mxu0 %vm628_vm2, %v2040_v41 }
 0x82d   : > { %v2115_v19 = vpop.f32.mrb[10].mxu0 }
 0x82e   : > { %v2128_v20 = vadd.f32 %v2126_v18, %v2115_v19  ;;  %v2117_v39 = vpop.f32.mrb[11].mxu0 }
 0x82f   : > { %v2129_v35 = vadd.f32 %v2126_v18, %v2117_v39 }
 0x831   : > { %v2132_v21 = vcombine.low %v2128_v20, %v2129_v35 }
 0x833   : > { %2134 = vst [vmem:[%s583_s21] sm:$0xff] %v2132_v21 }
 0x834   : > { %2444 = shalt.err (!%p2441_p3)
}
 0x835   : > { %s2445_s19 = scalar_lea.hbm %s2847_s22, 128  ;;  %s2449_s27 = scalar_lea.hbm %s2935_s1, 256 }
 0x836   : > { %p2446_p4 = scmp.ne.s32.totalorder %s2847_s22, %s2445_s19  ;;  %p2450_p9 = scmp.lt.u32.totalorder %s2847_s22, %s2935_s1 }
 0x837   : > { %p2451_p10 = scmp.lt.u32.totalorder %s2449_s27, %s2445_s19  ;;  %p2453_p12 = scmp.lt.u32.totalorder %s2445_s19, %s2847_s22 }
 0x838   : > { %p2447_p7 = pnand %p2446_p4, %p2635_p5 }
 0x839   : > { %p2452_p11 = por %p2451_p10, %p2450_p9 }
 0x83a   : > { %p2448_p8 = pneg %p2447_p7 }
 0x83b   : > { %p2454_p13 = por %p2453_p12, %p2452_p11 }
 0x83d   : > { %p2455_p0 = pnand %p2454_p13, %p2448_p8 }
 0x83f   : > { %2458 = shalt.err (!%p2455_p0)
}
 0x840   : > { %2350 = dma.vmem_to_hbm [thread:$0]  (%p2635_p5), %s2849_s18, 128, %s2847_s22, %s2136_s2  }
 0x841 PF: > { %s2936_s24 = sld [smem:[#allocation7_spill]]  ;;  %s2937_s0 = sld [smem:[#allocation5_spill]] }
 0x847   : > { %p2356_p1 = scmp.ge.s32.totalorder %s2936_s24, 2  ;;  %s2162_s23 = sand.u32 1, %s2937_s0  }
 0x848   : > { %s2163_s20 = scalar_lea.sflag [#allocation3], %s2162_s23 }
 0x849   : > { %p2353_p2 = pnand %p2356_p1, %p2639_p6 }
 0x84b   : > { %2476 = dma.done.wait (!%p2353_p2), %s2163_s20, 128  }
 0x84c   : > { %2478 = vsyncadd (!%p2353_p2), %s2163_s20, 4294967168  ;;  %s2939_s30 = sld [smem:[#allocation8_spill]]  ;;  %s2940_s19 = sld [smem:[#allocation6_spill]] }
 0x84d   : > { %s2941_s29 = sld [smem:[#allocation9_spill]]  ;;  %s2942_s27 = smov %s2485_s28 }
 0x852   : > { %p28_p3 = scmp.ge.s32.totalorder %s2939_s30, 4   ;;  %s2943_s28 = smov %s2940_s19 }
 0x854   :  { %30 = sbr.rel (!%p28_p3) target bundleno = 8 (0x8), region = 130 }
 0x85b   :  { %2168 = vsyncpa [#allocation3], 1 }
 0x85c   :  { %2170 = vsyncpa [#allocation3 + $0x1], 1 }

</bundles_post_ra>
